<compile_context>
chip_gen: v7x
topology: tpu7x:2x2x1
jax: 0.10.0
libtpu: 0.0.40
codegen_flags: <defaults>
</compile_context>

<pallas_src>
import jax
import jax.numpy as jnp
from jax.experimental import pallas as pl
from jax.experimental.pallas import tpu as pltpu


def _round_up(x, m):
    return (x + m - 1) // m * m


def _vmem_limit_bytes():
    # v5e/v6e have 128 MiB VMEM per core, v7x only 64 MiB: derive the scoped
    # limit from the chip so double-buffering survives on every generation.
    try:
        cap = pltpu.get_tpu_info().vmem_capacity_bytes
        return int(min(cap - cap // 8, 112 * 1024 * 1024))
    except Exception:
        return 56 * 1024 * 1024


_VMEM_LIMIT = _vmem_limit_bytes()


def conv2_kernel(x_ref, w_ref, b_ref, o_ref):
    # x_ref: (1, H+2, W+2, C1) bf16  one zero-padded NHWC image (halo built in)
    # w_ref: (9*C1, TN)        bf16  BN-scaled fused (3x3 + centre-1x1) weights
    # b_ref: (1, TN)           f32   fused BN bias
    # o_ref: (1, H*W, TN)      bf16  SiLU(BN(conv)) for this image / C2 tile
    _, hp, wp, c1 = x_ref.shape
    h, w = hp - 2, wp - 2
    # In-kernel im2col: 9 shifted VMEM reads (no HBM patch slab), concatenated
    # lane-wise so a SINGLE MXU matmul contracts over the full 9*C1 depth.
    taps = [x_ref[0, dy:dy + h, dx:dx + w, :]
            for dy in range(3) for dx in range(3)]
    patches = jnp.concatenate(taps, axis=-1).reshape(h * w, 9 * c1)
    acc = jnp.dot(patches, w_ref[...], preferred_element_type=jnp.float32)
    acc = acc + b_ref[...]                                   # fused BN bias (f32)
    o_ref[0] = (acc * jax.nn.sigmoid(acc)).astype(o_ref.dtype)   # SiLU, cast on store


def fuse_bn(gamma, beta, rmean, rvar, eps=1e-5):
    """(scale, bias) such that eval-mode BN(y) == y*scale + bias per channel."""
    std = jnp.sqrt(rvar + eps)
    scale = gamma / std
    return scale, beta - rmean * scale


@jax.jit
def conv2_forward_nhwc(x_nhwc, params):
    """NHWC fast path: (N, H, W, C1) -> (N, H, W, C2) bfloat16."""
    N, H, W, C1 = x_nhwc.shape
    w3 = params["w3"]                      # (3, 3, C1, C2) HWIO
    w1 = params["w1"]                      # (C1, C2)
    C2 = w3.shape[-1]

    # Shared BN applies to the SUM of both branches, so fold the 1x1 branch
    # into the 3x3 centre tap (== Conv2.fuse_convs) and scale by BN.
    s, t = fuse_bn(params["gamma"], params["beta"], params["rmean"], params["rvar"])
    w_fused = (w3.at[1, 1].add(w1)) * s[None, None, None, :]        # (3,3,C1,C2)

    # bf16 BEFORE padding: one cheap pass, halves all downstream HBM traffic.
    x_pad = jnp.pad(x_nhwc.astype(jnp.bfloat16),
                    ((0, 0), (1, 1), (1, 1), (0, 0)))               # 'same' 3x3/s1

    K = 9 * C1                          # contraction depth — NOT padded to 128
    C2p = _round_up(C2, 128)            # lane-dense output channels
    HW = H * W

    # Weight residency: a single C2 tile whenever the fused weights are small
    # (a few MiB); otherwise 256/128-wide tiles.
    if K * C2p * 2 <= 8 * 1024 * 1024 or C2p <= 256:
        TN = C2p
    elif C2p % 256 == 0:
        TN = 256
    else:
        TN = 128
    n_c2 = C2p // TN

    w_mat = jnp.pad(w_fused.reshape(K, C2),
                    ((0, 0), (0, C2p - C2))).astype(jnp.bfloat16)
    b_mat = jnp.pad(t, (0, C2p - C2)).reshape(1, C2p).astype(jnp.float32)

    cost = pl.CostEstimate(
        flops=2 * N * HW * K * C2p,
        transcendentals=N * HW * C2p,
        bytes_accessed=(x_pad.size * 2 + w_mat.size * 2 + b_mat.size * 4
                        + N * HW * C2p * 2),
    )

    # TODO(synk): for very large padded images (H*W*C1 approaching VMEM/4) this
    # needs row-halo tiling (manual DMA of TH+2 rows per step) instead of
    # whole-image blocks; also with N == 1 the grid collapses to n_c2 steps
    # (one v7x core may idle).
    out = pl.pallas_call(
        conv2_kernel,
        out_shape=jax.ShapeDtypeStruct((N, HW, C2p), jnp.bfloat16),
        grid_spec=pltpu.PrefetchScalarGridSpec(
            num_scalar_prefetch=0,
            grid=(N, n_c2),                 # C2 innermost: image stays resident
            in_specs=[
                # Whole padded image per step: the 3x3 halo comes for free,
                # block index constant in j -> no re-fetch across C2 tiles.
                pl.BlockSpec((1, H + 2, W + 2, C1), lambda n, j: (n, 0, 0, 0)),
                # Fused weights / bias: block index constant in n -> DMA'd
                # exactly once when n_c2 == 1 (the common case).
                pl.BlockSpec((K, TN), lambda n, j: (0, j)),
                pl.BlockSpec((1, TN), lambda n, j: (0, j)),
            ],
            out_specs=pl.BlockSpec((1, HW, TN), lambda n, j: (n, 0, j)),
        ),
        compiler_params=pltpu.CompilerParams(
            dimension_semantics=("parallel", "parallel"),
            vmem_limit_bytes=_VMEM_LIMIT,
        ),
        cost_estimate=cost,
    )(x_pad, w_mat, b_mat)

    # Strip channel padding; the (N, HW, C2) -> (N, H, W, C2) reshape is free.
    return out[:, :, :C2].reshape(N, H, W, C2)


@jax.jit
def conv2_forward(x_nchw, params):
    """PyTorch-convention entry point: (N, C1, H, W) -> (N, C2, H, W) bf16.

    The NCHW<->NHWC transposes are pure layout plumbing outside the kernel;
    prefer conv2_forward_nhwc when the surrounding model is NHWC.
    """
    x_nhwc = jnp.transpose(x_nchw, (0, 2, 3, 1))
    y = conv2_forward_nhwc(x_nhwc, params)
    return jnp.transpose(y, (0, 3, 1, 2))


def conv2_reference(x_nchw, params):
    """Pure-JAX (f32, lax conv) reference of Conv2.forward in eval mode."""
    w3 = params["w3"]
    w1 = params["w1"]
    s, t = fuse_bn(params["gamma"], params["beta"], params["rmean"], params["rvar"])

    w3_oihw = jnp.transpose(w3, (3, 2, 0, 1))
    w1_oihw = jnp.transpose(w1, (1, 0))[:, :, None, None]

    y3 = jax.lax.conv_general_dilated(
        x_nchw, w3_oihw, window_strides=(1, 1), padding=((1, 1), (1, 1)),
        dimension_numbers=("NCHW", "OIHW", "NCHW"))
    y1 = jax.lax.conv_general_dilated(
        x_nchw, w1_oihw, window_strides=(1, 1), padding=((0, 0), (0, 0)),
        dimension_numbers=("NCHW", "OIHW", "NCHW"))
    z = (y3 + y1) * s[None, :, None, None] + t[None, :, None, None]
    return z * jax.nn.sigmoid(z)


if __name__ == "__main__":
    key = jax.random.PRNGKey(0)
    N, C1, C2, H, W = 2, 4, 8, 16, 16

    keys = jax.random.split(key, 8)
    x = jax.random.normal(keys[0], (N, C1, H, W), dtype=jnp.float32)

    params = {
        # conv (3x3, no bias) in HWIO; cv2 (1x1, no bias) as (C1, C2)
        "w3": jax.random.normal(keys[1], (3, 3, C1, C2), jnp.float32) * 0.1,
        "w1": jax.random.normal(keys[2], (C1, C2), jnp.float32) * 0.1,
        # shared BatchNorm2d(C2), eval mode (running stats)
        "gamma": jax.random.uniform(keys[3], (C2,), jnp.float32, 0.5, 1.5),
        "beta": jax.random.normal(keys[4], (C2,), jnp.float32) * 0.1,
        "rmean": jax.random.normal(keys[5], (C2,), jnp.float32) * 0.1,
        "rvar": jax.random.uniform(keys[6], (C2,), jnp.float32, 0.5, 1.5),
    }

    out = jax.block_until_ready(conv2_forward(x, params))
    ref = jax.block_until_ready(conv2_reference(x, params))

    assert out.shape == (N, C2, H, W)
    # bf16 operands + bf16 store (f32 accumulate) => relaxed tolerance vs f32 ref.
    err = float(jnp.max(jnp.abs(out.astype(jnp.float32) - ref)))
    assert jnp.allclose(out.astype(jnp.float32), ref, atol=3e-2, rtol=3e-2), err
    print("KERNEL_OK")
</pallas_src>

<mosaic_0001>
module attributes {stable_mosaic.version = 11 : i64} {
  func.func @conv2_kernel(%arg0: i32, %arg1: i32, %arg2: memref<1x18x18x4xbf16, #tpu.memory_space<vmem>>, %arg3: memref<36x128xbf16, #tpu.memory_space<vmem>>, %arg4: memref<1x128xf32, #tpu.memory_space<vmem>>, %arg5: memref<1x256x128xbf16, #tpu.memory_space<vmem>>) attributes {dimension_semantics = [#tpu.dimension_semantics<parallel>, #tpu.dimension_semantics<parallel>], iteration_bounds = array<i64: 2, 1>, scalar_prefetch = 0 : i64, scratch_operands = 0 : i64, tpu.core_type = #tpu.core_type<tc>, window_params = [{transform_indices = @transform_0, window_bounds = array<i64: 1, 18, 18, 4>}, {transform_indices = @transform_1, window_bounds = array<i64: 36, 128>}, {transform_indices = @transform_2, window_bounds = array<i64: 1, 128>}, {transform_indices = @transform_3, window_bounds = array<i64: 1, 256, 128>}]} {
    %c0 = arith.constant 0 : index
    %c0_0 = arith.constant 0 : index
    %c0_1 = arith.constant 0 : index
    %c0_2 = arith.constant 0 : index
    %0 = vector.load %arg2[%c0, %c0_0, %c0_1, %c0_2] : memref<1x18x18x4xbf16, #tpu.memory_space<vmem>>, vector<1x16x16x4xbf16>
    %1 = vector.shape_cast %0 : vector<1x16x16x4xbf16> to vector<16x16x4xbf16>
    %c0_3 = arith.constant 0 : index
    %c0_4 = arith.constant 0 : index
    %c1 = arith.constant 1 : index
    %c0_5 = arith.constant 0 : index
    %2 = vector.load %arg2[%c0_3, %c0_4, %c1, %c0_5] : memref<1x18x18x4xbf16, #tpu.memory_space<vmem>>, vector<1x16x16x4xbf16>
    %3 = vector.shape_cast %2 : vector<1x16x16x4xbf16> to vector<16x16x4xbf16>
    %c0_6 = arith.constant 0 : index
    %c0_7 = arith.constant 0 : index
    %c2 = arith.constant 2 : index
    %c0_8 = arith.constant 0 : index
    %4 = vector.load %arg2[%c0_6, %c0_7, %c2, %c0_8] : memref<1x18x18x4xbf16, #tpu.memory_space<vmem>>, vector<1x16x16x4xbf16>
    %5 = vector.shape_cast %4 : vector<1x16x16x4xbf16> to vector<16x16x4xbf16>
    %c0_9 = arith.constant 0 : index
    %c1_10 = arith.constant 1 : index
    %c0_11 = arith.constant 0 : index
    %c0_12 = arith.constant 0 : index
    %6 = vector.load %arg2[%c0_9, %c1_10, %c0_11, %c0_12] : memref<1x18x18x4xbf16, #tpu.memory_space<vmem>>, vector<1x16x16x4xbf16>
    %7 = vector.shape_cast %6 : vector<1x16x16x4xbf16> to vector<16x16x4xbf16>
    %c0_13 = arith.constant 0 : index
    %c1_14 = arith.constant 1 : index
    %c1_15 = arith.constant 1 : index
    %c0_16 = arith.constant 0 : index
    %8 = vector.load %arg2[%c0_13, %c1_14, %c1_15, %c0_16] : memref<1x18x18x4xbf16, #tpu.memory_space<vmem>>, vector<1x16x16x4xbf16>
    %9 = vector.shape_cast %8 : vector<1x16x16x4xbf16> to vector<16x16x4xbf16>
    %c0_17 = arith.constant 0 : index
    %c1_18 = arith.constant 1 : index
    %c2_19 = arith.constant 2 : index
    %c0_20 = arith.constant 0 : index
    %10 = vector.load %arg2[%c0_17, %c1_18, %c2_19, %c0_20] : memref<1x18x18x4xbf16, #tpu.memory_space<vmem>>, vector<1x16x16x4xbf16>
    %11 = vector.shape_cast %10 : vector<1x16x16x4xbf16> to vector<16x16x4xbf16>
    %c0_21 = arith.constant 0 : index
    %c2_22 = arith.constant 2 : index
    %c0_23 = arith.constant 0 : index
    %c0_24 = arith.constant 0 : index
    %12 = vector.load %arg2[%c0_21, %c2_22, %c0_23, %c0_24] : memref<1x18x18x4xbf16, #tpu.memory_space<vmem>>, vector<1x16x16x4xbf16>
    %13 = vector.shape_cast %12 : vector<1x16x16x4xbf16> to vector<16x16x4xbf16>
    %c0_25 = arith.constant 0 : index
    %c2_26 = arith.constant 2 : index
    %c1_27 = arith.constant 1 : index
    %c0_28 = arith.constant 0 : index
    %14 = vector.load %arg2[%c0_25, %c2_26, %c1_27, %c0_28] : memref<1x18x18x4xbf16, #tpu.memory_space<vmem>>, vector<1x16x16x4xbf16>
    %15 = vector.shape_cast %14 : vector<1x16x16x4xbf16> to vector<16x16x4xbf16>
    %c0_29 = arith.constant 0 : index
    %c2_30 = arith.constant 2 : index
    %c2_31 = arith.constant 2 : index
    %c0_32 = arith.constant 0 : index
    %16 = vector.load %arg2[%c0_29, %c2_30, %c2_31, %c0_32] : memref<1x18x18x4xbf16, #tpu.memory_space<vmem>>, vector<1x16x16x4xbf16>
    %17 = vector.shape_cast %16 : vector<1x16x16x4xbf16> to vector<16x16x4xbf16>
    %18 = tpu.concatenate %1, %3, %5, %7, %9, %11, %13, %15, %17 in 2 : vector<16x16x4xbf16>, vector<16x16x4xbf16>, vector<16x16x4xbf16>, vector<16x16x4xbf16>, vector<16x16x4xbf16>, vector<16x16x4xbf16>, vector<16x16x4xbf16>, vector<16x16x4xbf16>, vector<16x16x4xbf16> -> vector<16x16x36xbf16>
    %19 = vector.shape_cast %18 : vector<16x16x36xbf16> to vector<256x36xbf16>
    %c0_33 = arith.constant 0 : index
    %c0_34 = arith.constant 0 : index
    %20 = vector.load %arg3[%c0_33, %c0_34] : memref<36x128xbf16, #tpu.memory_space<vmem>>, vector<36x128xbf16>
    %cst = arith.constant dense<0.000000e+00> : vector<256x128xf32>
    %21 = tpu.matmul %19, %20, %cst {dimension_numbers = #tpu.dot_dimension_numbers<[1], [0], [0], [1], [0, 0, 1, 1], [], []>} : vector<256x36xbf16>, vector<36x128xbf16>, vector<256x128xf32> -> vector<256x128xf32>
    %c0_35 = arith.constant 0 : index
    %c0_36 = arith.constant 0 : index
    %22 = vector.load %arg4[%c0_35, %c0_36] : memref<1x128xf32, #tpu.memory_space<vmem>>, vector<1x128xf32>
    %23 = vector.broadcast %22 : vector<1x128xf32> to vector<256x128xf32>
    %24 = arith.addf %21, %23 : vector<256x128xf32>
    %25 = arith.negf %24 : vector<256x128xf32>
    %26 = math.exp %25 : vector<256x128xf32>
    %cst_37 = arith.constant 1.000000e+00 : f32
    %27 = vector.broadcast %cst_37 : f32 to vector<256x128xf32>
    %28 = arith.addf %27, %26 : vector<256x128xf32>
    %29 = arith.divf %27, %28 : vector<256x128xf32>
    %30 = arith.mulf %24, %29 : vector<256x128xf32>
    %31 = arith.truncf %30 : vector<256x128xf32> to vector<256x128xbf16>
    %c0_38 = arith.constant 0 : index
    %c0_39 = arith.constant 0 : index
    %c0_40 = arith.constant 0 : index
    %32 = vector.load %arg5[%c0_38, %c0_39, %c0_40] : memref<1x256x128xbf16, #tpu.memory_space<vmem>>, vector<1x256x128xbf16>
    %33 = vector.shape_cast %32 : vector<1x256x128xbf16> to vector<256x128xbf16>
    %34 = vector.shape_cast %31 : vector<256x128xbf16> to vector<1x256x128xbf16>
    tpu.vector_store %arg5[%c0_38, %c0_39, %c0_40], %34 {strides = array<i32>} : memref<1x256x128xbf16, #tpu.memory_space<vmem>>, vector<1x256x128xbf16>,
    return
  }
  func.func @transform_0(%arg0: i32, %arg1: i32) -> (i32, i32, i32, i32) {
    %c0_i32 = arith.constant 0 : i32
    %c0_i32_0 = arith.constant 0 : i32
    %c0_i32_1 = arith.constant 0 : i32
    %c0_i32_2 = arith.constant 0 : i32
    return %arg0, %c0_i32, %c0_i32_0, %c0_i32_1 : i32, i32, i32, i32
  }
  func.func @transform_1(%arg0: i32, %arg1: i32) -> (i32, i32) {
    %c0_i32 = arith.constant 0 : i32
    %c0_i32_0 = arith.constant 0 : i32
    return %c0_i32, %arg1 : i32, i32
  }
  func.func @transform_2(%arg0: i32, %arg1: i32) -> (i32, i32) {
    %c0_i32 = arith.constant 0 : i32
    %c0_i32_0 = arith.constant 0 : i32
    return %c0_i32, %arg1 : i32, i32
  }
  func.func @transform_3(%arg0: i32, %arg1: i32) -> (i32, i32, i32) {
    %c0_i32 = arith.constant 0 : i32
    %c0_i32_0 = arith.constant 0 : i32
    return %arg0, %c0_i32, %arg1 : i32, i32, i32
  }
}

</mosaic_0001>

<bundles_post_ra>
// kernel: conv2_forward_nhwc.1
= control target key start
LH: loop header
LB: loop body
LE: loop exit
PB: predicated region body
PF: predicated region fallthrough
CT: control target
= control target key end

     0   :  { %s3822_s12 = smov 0   ;;  %s3824_s13 = smov 0   ;;  %s5155_s0 = inlined_call_operand.vmem [shape: bf16[2,18,18,4], index: 0, kind: input, shape index: {}]   ;;  %s5156_s1 = inlined_call_operand.vmem [shape: bf16[36,128], index: 1, kind: input, shape index: {}]   ;;  %s5157_s2 = inlined_call_operand.vmem [shape: f32[1,128], index: 2, kind: input, shape index: {}]   ;;  %s5158_s3 = inlined_call_operand.vmem [shape: bf16[2,256,128], index: 3, kind: output, shape index: {}]  }
   0x1   :  { %s3826_s14 = smov 0  }
   0x2 LB: > { %s25_s15 = sadd.s32 1, %s3788_s13  ;;  %p2907_p0 = scmp.ge.s32.totalorder %s3792_s14, 1  ;;  %s3792_s14 = sphi %s3826_s14, %s13_s14   ;;  %s3788_s13 = sphi %s3824_s13, %s5172_s13   ;;  %s3784_s12 = sphi %s3822_s12, %s5171_s12  }
   0x3   : > { %p27_p1 = scmp.ge.s32.totalorder %s25_s15, 2  ;;  %p168_p2 = scmp.lt.s32.totalorder %s3792_s14, 3 }
   0x5   : > { %s5174_s15 = smov (%p27_p1, %s25_s15), 0  ;;  %p169_p3 = pnand %p2907_p0, %p168_p2 }
   0x7   : > { %172 = sbr.rel (%p169_p3) target bundleno = 645 (0x285), region = 32 }
   0xe   : > { %p202_p4 = scmp.lt.s32.totalorder %s3784_s12, 1  ;;  %s3794_s20 = smov 12   ;;  %vm818_vm0 = vcmask 1046528   ;;  %vm545_vm1 = vsmask.f32 7424  ;;  %vm2247_vm2 = vcmask 1041408  }
   0xf   : > { %s3795_s21 = smov 8   ;;  %s3796_s22 = smov 4   ;;  %vm1923_vm3 = vcmask 31744   ;;  %vm1956_vm4 = vcmask 64512   ;;  %vm1989_vm5 = vcmask 97280   ;;  %vm2022_vm6 = vcmask 130048  }
  0x10   : > { %s5176_s12 = smov (!%p202_p4, %s3784_s12), 1  ;;  %s3797_s23 = smov 16   ;;  %vm2055_vm7 = vcmask 162816   ;;  %vm2088_vm8 = vcmask 195584   ;;  %vm2121_vm9 = vcmask 228352   ;;  %vm2154_vm10 = vcmask 261120  }
  0x11   : > { %s3462_s16 = smul.u32 216, %s5176_s12  ;;  %s3798_s24 = smov 20   ;;  %vm2214_vm11 = vcmask 293888  }
  0x12   : > { %s3799_s27 = smov 24   ;;  %s3800_s30 = smov 28  }
  0x13   : > { %s3846_s19 = scalar_lea.vmem %s5155_s0, %s3462_s16  ;;  %s3801_s4 = smov 32  }
  0x14   : > { %v2927_v0 = vld [vmem:[%s3846_s19 + $0x6c] sm:$0xf]  ;;  %v3850_v1 = vld [vmem:[%s3846_s19 + $0x70] sm:$0xf]  ;;  %v240_v6 = vld [vmem:[%s3846_s19 + $0x64] sm:$0xf] }
  0x15   : > { %v3853_v2 = vcombine.low %v2927_v0, %v3850_v1  ;;  %v2911_v3 = vld [vmem:[%s3846_s19 + $0xc] sm:$0xf]  ;;  %v3857_v4 = vld [vmem:[%s3846_s19 + $0x10] sm:$0xf]  ;;  %v279_v7 = vld [vmem:[%s3846_s19 + $0x60] sm:$0xe] }
  0x16   : > { %v3860_v5 = vcombine.low %v2911_v3, %v3857_v4  ;;  %v3867_v8 = vld [vmem:[%s3846_s19 + $0x68] ss:$0 sps:$4 sm:$0x11]   ;;  %v3079_v9 = vcombine.low %v279_v7, %v240_v6  ;;  %v239_v10 = vld [vmem:[%s3846_s19 + $0x60] sm:$0xf]  ;;  %s3269_s9 = sshll.u32 %s5176_s12, 7 }
  0x17   : > { %995 = vrot.lane.b32.xlu1 %v3853_v2, %s3794_s20  ;;  %v1158_v11 = vshll.u32 %v3853_v2, 16  ;;  %v224_v12 = vld [vmem:[%s3846_s19 + $0x4] sm:$0xf]  ;;  %v844_v14 = vrot.slane %v3867_v8, 1  ;;  %v271_v15 = vld [vmem:[%s3846_s19] sm:$0xe]  ;;  %v3878_v18 = vcombine.low %v239_v10, %v240_v6  ;;  %s5079_s16 = scalar_lea.vmem %s5158_s3, %s3269_s9 }
  0x18   : > { %979 = vrot.lane.b32.xlu0 %v3860_v5, %s3794_s20  ;;  %v843_v13 = vrot.slane %v3079_v9, 1  ;;  %v223_v16 = vld [vmem:[%s3846_s19] sm:$0xf]  ;;  %v1062_v17 = vshll.u32 %v3860_v5, 16  ;;  %v3071_v20 = vcombine.low %v271_v15, %v224_v12  ;;  %v241_v21 = vld [vmem:[%s3846_s19 + $0x6c] sm:$0xf] }
  0x19   : > { %v3502_v19 = vld [vmem:[%s3846_s19 + $0x8] ss:$0 sps:$4 sm:$0x11]   ;;  %v3883_v23 = vcombine.low %v223_v16, %v224_v12  ;;  %v242_v24 = vld [vmem:[%s3846_s19 + $0x70] sm:$0xf]  ;;  %v643_v30 = vshrl.u32 %v3878_v18, 16 }
  0x1a   : > { %v845_v22 = vsel %vm818_vm0, %v843_v13, %v844_v14  ;;  %v280_v25 = vld [vmem:[%s3846_s19 + $0x6c] sm:$0xe]  ;;  %v819_v26 = vrot.slane %v3071_v20, 1  ;;  %v820_v27 = vrot.slane %v3502_v19, 1  ;;  %v3890_v31 = vcombine.low %v241_v21, %v242_v24  ;;  %v226_v33 = vld [vmem:[%s3846_s19 + $0x10] sm:$0xf] }
  0x1b   : > { %883 = vrot.lane.b32.xlu1 %v845_v22, %s3795_s21  ;;  %v3506_v28 = vld [vmem:[%s3846_s19 + $0x74] ss:$0 sps:$4 sm:$0x11]   ;;  %v3080_v29 = vcombine.low %v280_v25, %v242_v24  ;;  %v225_v32 = vld [vmem:[%s3846_s19 + $0xc] sm:$0xf]  ;;  %v547_v41 = vshrl.u32 %v3883_v23, 16 }
  0x1c   : > { %v821_v34 = vsel %vm818_vm0, %v819_v26, %v820_v27  ;;  %v847_v36 = vrot.slane %v3506_v28, 1  ;;  %v272_v37 = vld [vmem:[%s3846_s19 + $0xc] sm:$0xe]  ;;  %v3896_v38 = vcombine.low %v225_v32, %v226_v33  ;;  %v3509_v39 = vld [vmem:[%s3846_s19 + $0x14] ss:$0 sps:$4 sm:$0x11]  }
  0x1d   : > { %v846_v35 = vrot.slane %v3080_v29, 1  ;;  %867 = vrot.lane.b32.xlu0 %v821_v34, %s3795_s21  ;;  %v3072_v40 = vcombine.low %v272_v37, %v226_v33  ;;  %v549_v42 = vshll.u32 %v3883_v23, 16  ;;  %v554_v43 = vshll.u32 %v3502_v19, 16  ;;  %v2929_v52 = vld [vmem:[%s3846_s19 + $0x78] sm:$0xf] }
  0x1e   : > { %v559_v45 = vshrl.u32 %v3896_v38, 16  ;;  %v561_v46 = vshll.u32 %v3896_v38, 16  ;;  %v655_v47 = vshrl.u32 %v3890_v31, 16  ;;  %v823_v49 = vrot.slane %v3509_v39, 1  ;;  %v3910_v57 = vld [vmem:[%s3846_s19 + $0x7c] sm:$0xf] }
  0x1f   : > { %v848_v44 = vsel %vm818_vm0, %v846_v35, %v847_v36  ;;  %v822_v48 = vrot.slane %v3072_v40, 1  ;;  %v566_v50 = vshll.u32 %v3509_v39, 16  ;;  %v551_v51 = vrot.slane %v549_v42, 1  ;;  %v2913_v62 = vld [vmem:[%s3846_s19 + $0x18] sm:$0xf] }
  0x20   : > { %885 = vrot.lane.b32.xlu1 %v848_v44, %s3795_s21  ;;  %v563_v53 = vrot.slane %v561_v46, 1  ;;  %v556_v54 = vrot.slane %v554_v43, 1  ;;  %v657_v55 = vshll.u32 %v3890_v31, 16  ;;  %v662_v56 = vshll.u32 %v3506_v28, 16  ;;  %v3916_v63 = vld [vmem:[%s3846_s19 + $0x1c] sm:$0xf] }
  0x21   : > { %v824_v58 = vsel %vm818_vm0, %v822_v48, %v823_v49  ;;  %v568_v59 = vrot.slane %v566_v50, 1  ;;  %v552_v60 = vor.u32 %v551_v51, %v547_v41  ;;  %v645_v61 = vshll.u32 %v3878_v18, 16  ;;  %v3923_v13 = vld [vmem:[%s3846_s19 + $0x74] ss:$0 sps:$4 sm:$0x11]  }
  0x22   : > { %869 = vrot.lane.b32.xlu0 %v824_v58, %s3795_s21  ;;  %v564_v0 = vor.u32 %v563_v53, %v559_v45  ;;  %v659_v3 = vrot.slane %v657_v55, 1  ;;  %v664_v6 = vrot.slane %v662_v56, 1  ;;  %v650_v7 = vshll.u32 %v3867_v8, 16  ;;  %v3928_v20 = vld [vmem:[%s3846_s19 + $0x14] ss:$0 sps:$4 sm:$0x11]  }
  0x23   : > { %v557_v9 = vsel %vm545_vm1, %v552_v60, %v556_v54  ;;  %v647_v10 = vrot.slane %v645_v61, 1  ;;  %v3096_v12 = vcombine.low %v2929_v52, %v3910_v57  ;;  %v3088_v19 = vcombine.low %v2913_v62, %v3916_v63  ;;  %v3935_v24 = vld [vmem:[%s3846_s19 + $0x80] ss:$0 sps:$4 sm:$0x11]   ;;  %v2967_v40 = vld [vmem:[%s3846_s19 + $0x6c] sm:$0xe] }
  0x24   : > { %v569_v14 = vsel %vm545_vm1, %v564_v0, %v568_v59  ;;  %v660_v15 = vor.u32 %v659_v3, %v655_v47  ;;  %v652_v16 = vrot.slane %v650_v7, 1  ;;  %v1156_v21 = vshrl.u32 %v3853_v2, 16  ;;  %v2959_v43 = vld [vmem:[%s3846_s19 + $0xc] sm:$0xe]  ;;  %v2968_v49 = vld [vmem:[%s3846_s19 + $0x78] sm:$0xe] }
  0x25   : > { %740 = vrot.lane.b32.xlu1 %v569_v14, %s3796_s22  ;;  %v648_v8 = vor.u32 %v647_v10, %v643_v30  ;;  %v1160_v22 = vrot.slane %v1158_v11, 1  ;;  %v1170_v26 = vshll.u32 %v3096_v12, 16  ;;  %v1163_v27 = vshll.u32 %v3923_v13, 16  ;;  %v3946_v11 = vld [vmem:[%s3846_s19 + $0x20] ss:$0 sps:$4 sm:$0x11]  }
  0x26   : > { %738 = vrot.lane.b32.xlu0 %v557_v9, %s3796_s22  ;;  %v665_v25 = vsel %vm545_vm1, %v660_v15, %v664_v6  ;;  %v1060_v28 = vshrl.u32 %v3860_v5, 16  ;;  %v1074_v30 = vshll.u32 %v3088_v19, 16  ;;  %v1064_v32 = vrot.slane %v1062_v17, 1  ;;  %v2960_v53 = vld [vmem:[%s3846_s19 + $0x18] sm:$0xe] }
  0x27   : > { %v653_v29 = vsel %vm545_vm1, %v648_v8, %v652_v16  ;;  %v1067_v2 = vshll.u32 %v3928_v20, 16  ;;  %v1161_v33 = vor.u32 %v1160_v22, %v1156_v21  ;;  %v1165_v34 = vrot.slane %v1163_v27, 1  ;;  %v2991_v54 = vld [vmem:[%s3846_s19 + $0x78] sm:$0xf]  ;;  %v3973_v60 = vld [vmem:[%s3846_s19 + $0x1c] sm:$0xf] }
  0x28   : > { %v1065_v35 = vor.u32 %v1064_v32, %v1060_v28  ;;  %v1168_v36 = vshrl.u32 %v3096_v12, 16  ;;  %v1172_v37 = vrot.slane %v1170_v26, 1  ;;  %v1175_v39 = vshll.u32 %v3935_v24, 16  ;;  %v2975_v55 = vld [vmem:[%s3846_s19 + $0x18] sm:$0xf] }
  0x29   : > { %756 = vrot.lane.b32.xlu1 %v665_v25, %s3796_s22  ;;  %v1069_v5 = vrot.slane %v1067_v2, 1  ;;  %v1072_v17 = vshrl.u32 %v3088_v19, 16  ;;  %v1076_v41 = vrot.slane %v1074_v30, 1  ;;  %v1079_v42 = vshll.u32 %v3946_v11, 16  ;;  %v2993_v7 = vld [vmem:[%s3846_s19 + $0x84] sm:$0xf] }
  0x2a   : > { %754 = vrot.lane.b32.xlu0 %v653_v29, %s3796_s22  ;;  %v3127_v44 = vcombine.low %v2967_v40, %v3850_v1  ;;  %v1166_v45 = vsel %vm545_vm1, %v1161_v33, %v1165_v34  ;;  %v1173_v46 = vor.u32 %v1172_v37, %v1168_v36  ;;  %v1177_v47 = vrot.slane %v1175_v39, 1  ;;  %v3965_v1 = vld [vmem:[%s3846_s19 + $0x7c] sm:$0xf]  ;;  %v3983_v9 = vld [vmem:[%s3846_s19 + $0x88] sm:$0xf] }
  0x2b   : > { %v3119_v48 = vcombine.low %v2959_v43, %v3857_v4  ;;  %v1070_v50 = vsel %vm545_vm1, %v1065_v35, %v1069_v5  ;;  %v1077_v51 = vor.u32 %v1076_v41, %v1072_v17  ;;  %v1081_v52 = vrot.slane %v1079_v42, 1  ;;  %v3990_v14 = vld [vmem:[%s3846_s19 + $0x28] sm:$0xf]  ;;  %v3996_v21 = vld [vmem:[%s3846_s19 + $0x80] ss:$0 sps:$4 sm:$0x11]  }
  0x2c   : > { %v3128_v56 = vcombine.low %v2968_v49, %v3910_v57  ;;  %v1178_v4 = vsel %vm545_vm1, %v1173_v46, %v1177_v47  ;;  %v1355_v58 = vrot.slane %v3127_v44, 1  ;;  %v1356_v59 = vrot.slane %v3923_v13, 1  ;;  %v2977_v13 = vld [vmem:[%s3846_s19 + $0x24] sm:$0xf]  ;;  %v243_v37 = vld [vmem:[%s3846_s19 + $0x78] sm:$0xf] }
  0x2d   : > { %997 = vrot.lane.b32.xlu1 %v3096_v12, %s3794_s20  ;;  %v3120_v61 = vcombine.low %v2960_v53, %v3916_v63  ;;  %v1082_v62 = vsel %vm545_vm1, %v1077_v51, %v1081_v52  ;;  %v1331_v0 = vrot.slane %v3119_v48, 1  ;;  %v1332_v3 = vrot.slane %v3928_v20, 1  ;;  %v4003_v26 = vld [vmem:[%s3846_s19 + $0x20] ss:$0 sps:$4 sm:$0x11]  }
  0x2e   : > { %981 = vrot.lane.b32.xlu0 %v3088_v19, %s3794_s20  ;;  %v3143_v57 = vcombine.low %v2991_v54, %v3965_v1  ;;  %v3135_v6 = vcombine.low %v2975_v55, %v3973_v60  ;;  %v1357_v10 = vsel %vm818_vm0, %v1355_v58, %v1356_v59  ;;  %v1358_v63 = vrot.slane %v3128_v56, 1  ;;  %v4009_v34 = vld [vmem:[%s3846_s19 + $0x8c] ss:$0 sps:$4 sm:$0x11]   ;;  %v4018_v39 = vld [vmem:[%s3846_s19 + $0x7c] sm:$0xf] }
  0x2f   : > { %v1359_v12 = vrot.slane %v3935_v24, 1  ;;  %v1333_v15 = vsel %vm818_vm0, %v1331_v0, %v1332_v3  ;;  %v1334_v16 = vrot.slane %v3120_v61, 1  ;;  %v1335_v19 = vrot.slane %v3946_v11, 1  ;;  %v4014_v36 = vld [vmem:[%s3846_s19 + $0x2c] ss:$0 sps:$4 sm:$0x11]  }
  0x30   : > { %v1670_v20 = vshll.u32 %v3143_v57, 16  ;;  %v3144_v8 = vcombine.low %v2993_v7, %v3983_v9  ;;  %v1574_v22 = vshll.u32 %v3135_v6, 16  ;;  %v3136_v24 = vcombine.low %v2977_v13, %v3990_v14  ;;  %v227_v40 = vld [vmem:[%s3846_s19 + $0x18] sm:$0xf]  ;;  %v4022_v17 = vld [vmem:[%s3846_s19 + $0x1c] sm:$0xf] }
  0x31   : > { %1267 = vrot.lane.b32.xlu1 %v1166_v45, %s3797_s23  ;;  %v1360_v25 = vsel %vm818_vm0, %v1358_v63, %v1359_v12  ;;  %v1336_v27 = vsel %vm818_vm0, %v1334_v16, %v1335_v19  ;;  %v1668_v29 = vshrl.u32 %v3143_v57, 16  ;;  %v1675_v32 = vshll.u32 %v3996_v21, 16  ;;  %v3591_v41 = vld [vmem:[%s5156_s1] sm:$0xff]   ;;  %v3031_v42 = vld [vmem:[%s3846_s19 + $0x78] sm:$0xe]  ;;  %v3596_v56 = vld [vmem:[%s5156_s1 + $0x8] sm:$0xff]  }
  0x32   : > { %1251 = vrot.lane.b32.xlu0 %v1070_v50, %s3797_s23  ;;  %v1682_v28 = vshll.u32 %v3144_v8, 16  ;;  %v1672_v30 = vrot.slane %v1670_v20, 1  ;;  %v1586_v2 = vshll.u32 %v3136_v24, 16  ;;  %v1572_v11 = vshrl.u32 %v3135_v6, 16  ;;  %v3023_v47 = vld [vmem:[%s3846_s19 + $0x18] sm:$0xe]  ;;  %3416 = vmatprep.subr.bf16.mxu0 %v3591_v41 }
  0x33   : > { %v1576_v33 = vrot.slane %v1574_v22, 1  ;;  %v1579_v35 = vshll.u32 %v4003_v26, 16  ;;  %v1677_v43 = vrot.slane %v1675_v32, 1  ;;  %v1680_v44 = vshrl.u32 %v3144_v8, 16  ;;  %3454 = vmatprep.subr.bf16.mxu1 %v3591_v41  ;;  %3417 = vmatpush3.bf16.msra.mxu0 %v3591_v41  ;;  %v245_v7 = vld [vmem:[%s3846_s19 + $0x84] sm:$0xf] }
  0x34   : > { %v1673_v5 = vor.u32 %v1672_v30, %v1668_v29  ;;  %v1684_v45 = vrot.slane %v1682_v28, 1  ;;  %v1687_v46 = vshll.u32 %v4009_v34, 16  ;;  %v1584_v48 = vshrl.u32 %v3136_v24, 16  ;;  %3457 = vmatpush3.bf16.msra.mxu1 %v3591_v41  ;;  %v4046_v61 = vld [vmem:[%s3846_s19 + $0x80] ss:$0 sps:$4 sm:$0x11]   ;;  %3418 = vmatprep.subr.bf16.mxu0 %v3596_v56 }
  0x35   : > { %1269 = vrot.lane.b32.xlu1 %v1178_v4, %s3797_s23  ;;  %v1588_v49 = vrot.slane %v1586_v2, 1  ;;  %v1591_v50 = vshll.u32 %v4014_v36, 16  ;;  %v4034_v51 = vcombine.low %v243_v37, %v4018_v39  ;;  %v1577_v52 = vor.u32 %v1576_v33, %v1572_v11  ;;  %3455 = vmatprep.subr.bf16.mxu1 %v3596_v56  ;;  %v229_v13 = vld [vmem:[%s3846_s19 + $0x24] sm:$0xf] }
  0x36   : > { %1253 = vrot.lane.b32.xlu0 %v1082_v62, %s3797_s23  ;;  %v1581_v53 = vrot.slane %v1579_v35, 1  ;;  %v4037_v54 = vcombine.low %v227_v40, %v4022_v17  ;;  %v3175_v55 = vcombine.low %v3031_v42, %v3965_v1  ;;  %v3167_v4 = vcombine.low %v3023_v47, %v3973_v60  ;;  %v3032_v16 = vld [vmem:[%s3846_s19 + $0x84] sm:$0xe]  ;;  %v4088_v40 = vld [vmem:[%s3846_s19 + $0x8c] ss:$0 sps:$4 sm:$0x11]  }
  0x37   : > { %v1685_v58 = vor.u32 %v1684_v45, %v1680_v44  ;;  %v1689_v59 = vrot.slane %v1687_v46, 1  ;;  %v1678_v1 = vsel %vm545_vm1, %v1673_v5, %v1677_v43  ;;  %v1589_v62 = vor.u32 %v1588_v49, %v1584_v48  ;;  %3419 = vmatpush3.bf16.msra.mxu0 %v3596_v56 }
  0x38   : > { %v1593_v0 = vrot.slane %v1591_v50, 1  ;;  %v669_v3 = vshll.u32 %v4034_v51, 16  ;;  %v1582_v60 = vsel %vm545_vm1, %v1577_v52, %v1581_v53  ;;  %v1867_v63 = vrot.slane %v3175_v55, 1  ;;  %3458 = vmatpush3.bf16.msra.mxu1 %v3596_v56  ;;  %v281_v53 = vld [vmem:[%s3846_s19 + $0x78] sm:$0xe] }
  0x39   : > { %1395 = vrot.lane.b32.xlu1 %v1357_v10, %s3798_s24  ;;  %v4058_v10 = vld [vmem:[%s3846_s19 + $0x88] sm:$0xf]  ;;  %v1868_v12 = vrot.slane %v3996_v21, 1  ;;  %v1690_v19 = vsel %vm545_vm1, %v1685_v58, %v1689_v59  ;;  %v1843_v20 = vrot.slane %v3167_v4, 1  ;;  %v674_v22 = vshll.u32 %v4046_v61, 16 }
  0x3a   : > { %1379 = vrot.lane.b32.xlu0 %v1333_v15, %s3798_s24  ;;  %v4063_v15 = vld [vmem:[%s3846_s19 + $0x28] sm:$0xf]  ;;  %v1594_v21 = vsel %vm545_vm1, %v1589_v62, %v1593_v0  ;;  %v4075_v28 = vcombine.low %v245_v7, %v4058_v10  ;;  %v571_v29 = vshrl.u32 %v4037_v54, 16  ;;  %v3176_v2 = vcombine.low %v3032_v16, %v3983_v9  ;;  %v4093_v9 = vld [vmem:[%s3846_s19 + $0x2c] ss:$0 sps:$4 sm:$0x11]  }
  0x3b   : > { %v4080_v32 = vcombine.low %v229_v13, %v4063_v15  ;;  %v676_v33 = vrot.slane %v674_v22, 1  ;;  %v1869_v35 = vsel %vm818_vm0, %v1867_v63, %v1868_v12  ;;  %v1871_v45 = vrot.slane %v4009_v34, 1  ;;  %v274_v63 = vld [vmem:[%s3846_s19 + $0x24] sm:$0xe] }
  0x3c   : > { %v681_v5 = vshll.u32 %v4075_v28, 16  ;;  %v1870_v44 = vrot.slane %v3176_v2, 1  ;;  %v1847_v47 = vrot.slane %v4014_v36, 1  ;;  %v679_v49 = vshrl.u32 %v4075_v28, 16  ;;  %v273_v36 = vld [vmem:[%s3846_s19 + $0x18] sm:$0xe] }
  0x3d   : > { %1397 = vrot.lane.b32.xlu1 %v1360_v25, %s3798_s24  ;;  %v667_v25 = vshrl.u32 %v4034_v51, 16  ;;  %v686_v52 = vshll.u32 %v4088_v40, 16  ;;  %v583_v56 = vshrl.u32 %v4080_v32, 16  ;;  %v590_v4 = vshll.u32 %v4093_v9, 16 }
  0x3e   : > { %1381 = vrot.lane.b32.xlu0 %v1336_v27, %s3798_s24  ;;  %v671_v27 = vrot.slane %v669_v3, 1  ;;  %v683_v50 = vrot.slane %v681_v5, 1  ;;  %v1872_v58 = vsel %vm818_vm0, %v1870_v44, %v1871_v45  ;;  %v3081_v62 = vcombine.low %v281_v53, %v4018_v39  ;;  %v282_v3 = vld [vmem:[%s3846_s19 + $0x84] sm:$0xe] }
  0x3f   : > { %v3073_v0 = vcombine.low %v273_v36, %v4022_v17  ;;  %v592_v7 = vrot.slane %v590_v4, 1  ;;  %v850_v12 = vrot.slane %v4046_v61, 1  ;;  %v3082_v16 = vcombine.low %v282_v3, %v4058_v10 }
  0x40   : > { %v672_v37 = vor.u32 %v671_v27, %v667_v25  ;;  %v684_v59 = vor.u32 %v683_v50, %v679_v49  ;;  %v849_v17 = vrot.slane %v3081_v62, 1  ;;  %v3074_v61 = vcombine.low %v274_v63, %v4063_v15  ;;  %v4140_v15 = vld [vmem:[%s3846_s19 + $0x94] sm:$0xf]  ;;  %v2961_v62 = vld [vmem:[%s3846_s19 + $0x24] sm:$0xe] }
  0x41   : > { %1507 = vrot.lane.b32.xlu1 %v3143_v57, %s3799_s27  ;;  %v4052_v57 = vld [vmem:[%s3846_s19 + $0x20] ss:$0 sps:$4 sm:$0x11]   ;;  %v852_v10 = vrot.slane %v3082_v16, 1 }
  0x42   : > { %1491 = vrot.lane.b32.xlu0 %v3135_v6, %s3799_s27  ;;  %v573_v6 = vshll.u32 %v4037_v54, 16  ;;  %v677_v48 = vsel %vm545_vm1, %v672_v37, %v676_v33  ;;  %v826_v13 = vrot.slane %v4052_v57, 1  ;;  %v851_v27 = vsel %vm818_vm0, %v849_v17, %v850_v12  ;;  %v2917_v33 = vld [vmem:[%s3846_s19 + $0x30] sm:$0xf] }
  0x43   : > { %v828_v2 = vrot.slane %v3074_v61, 1  ;;  %v2970_v12 = vld [vmem:[%s3846_s19 + $0x90] sm:$0xe] }
  0x44   : > { %v575_v30 = vrot.slane %v573_v6, 1  ;;  %v3130_v61 = vcombine.low %v2970_v12, %v4140_v15 }
  0x45   : > { %1509 = vrot.lane.b32.xlu1 %v3144_v8, %s3799_s27  ;;  %v1844_v8 = vrot.slane %v4003_v26, 1  ;;  %v578_v26 = vshll.u32 %v4052_v57, 16  ;;  %v2915_v57 = vld [vmem:[%s3846_s19 + $0x24] sm:$0xf] }
  0x46   : > { %1493 = vrot.lane.b32.xlu0 %v3136_v24, %s3799_s27  ;;  %v3024_v24 = vld [vmem:[%s3846_s19 + $0x24] sm:$0xe]  ;;  %v576_v42 = vor.u32 %v575_v30, %v571_v29  ;;  %v2933_v30 = vld [vmem:[%s3846_s19 + $0x90] sm:$0xf] }
  0x47   : > { %v3168_v11 = vcombine.low %v3024_v24, %v3990_v14  ;;  %v1845_v41 = vsel %vm818_vm0, %v1843_v20, %v1844_v8  ;;  %v580_v43 = vrot.slane %v578_v26, 1  ;;  %v585_v14 = vshll.u32 %v4080_v32, 16  ;;  %v2931_v20 = vld [vmem:[%s3846_s19 + $0x84] sm:$0xf]  ;;  %v4124_v8 = vld [vmem:[%s3846_s19 + $0x88] sm:$0xf] }
  0x48   : > { %v4130_v24 = vld [vmem:[%s3846_s19 + $0x28] sm:$0xf]  ;;  %v3097_v25 = vcombine.low %v2931_v20, %v4124_v8 }
  0x49   : > { %1779 = vrot.lane.b32.xlu1 %v1678_v1, %s3800_s30  ;;  %v1846_v46 = vrot.slane %v3168_v11, 1  ;;  %v581_v55 = vsel %vm545_vm1, %v576_v42, %v580_v43  ;;  %v587_v34 = vrot.slane %v585_v14, 1  ;;  %v688_v1 = vrot.slane %v686_v52, 1  ;;  %v3551_v43 = vld [vmem:[%s3846_s19 + $0x8c] ss:$0 sps:$4 sm:$0x11]  }
  0x4a   : > { %1763 = vrot.lane.b32.xlu0 %v1582_v60, %s3800_s30  ;;  %v3089_v29 = vcombine.low %v2915_v57, %v4130_v24  ;;  %v829_v11 = vrot.slane %v4093_v9, 1  ;;  %v1182_v37 = vshll.u32 %v3097_v25, 16  ;;  %v4156_v14 = vld [vmem:[%s3846_s19 + $0x2c] ss:$0 sps:$4 sm:$0x11]   ;;  %v1180_v45 = vshrl.u32 %v3097_v25, 16 }
  0x4b   : > { %v1848_v60 = vsel %vm818_vm0, %v1846_v46, %v1847_v47  ;;  %v588_v6 = vor.u32 %v587_v34, %v583_v56  ;;  %v689_v39 = vsel %vm545_vm1, %v684_v59, %v688_v1  ;;  %v1187_v49 = vshll.u32 %v3551_v43, 16  ;;  %v4161_v52 = vld [vmem:[%s3846_s19 + $0x98] ss:$0 sps:$4 sm:$0x11]   ;;  %v2969_v56 = vld [vmem:[%s3846_s19 + $0x84] sm:$0xe] }
  0x4c   : > { %v830_v9 = vsel %vm818_vm0, %v828_v2, %v829_v11  ;;  %v1184_v46 = vrot.slane %v1182_v37, 1  ;;  %v1084_v47 = vshrl.u32 %v3089_v29, 16  ;;  %v1091_v53 = vshll.u32 %v4156_v14, 16  ;;  %v2995_v57 = vld [vmem:[%s3846_s19 + $0x90] sm:$0xf] }
  0x4d   : > { %1781 = vrot.lane.b32.xlu1 %v1690_v19, %s3800_s30  ;;  %v825_v19 = vrot.slane %v3073_v0, 1  ;;  %v593_v22 = vsel %vm545_vm1, %v588_v6, %v592_v7  ;;  %v1189_v36 = vrot.slane %v1187_v49, 1  ;;  %v1199_v1 = vshll.u32 %v4161_v52, 16  ;;  %v2997_v11 = vld [vmem:[%s3846_s19 + $0x9c] sm:$0xf] }
  0x4e   : > { %1765 = vrot.lane.b32.xlu0 %v1594_v21, %s3800_s30  ;;  %v853_v21 = vrot.slane %v4088_v40, 1  ;;  %v3098_v40 = vcombine.low %v2933_v30, %v4140_v15  ;;  %v1185_v34 = vor.u32 %v1184_v46, %v1180_v45  ;;  %v1093_v0 = vrot.slane %v1091_v53, 1  ;;  %v4194_v15 = vld [vmem:[%s3846_s19 + $0x34] sm:$0xf]  ;;  %v4211_v45 = vld [vmem:[%s3846_s19 + $0x40] sm:$0xf] }
  0x4f   : > { %v827_v26 = vsel %vm818_vm0, %v825_v19, %v826_v13  ;;  %v3129_v7 = vcombine.low %v2969_v56, %v4124_v8  ;;  %v3121_v63 = vcombine.low %v2961_v62, %v4130_v24  ;;  %v4185_v24 = vld [vmem:[%s3846_s19 + $0x94] sm:$0xf]  ;;  %v4214_v46 = vld [vmem:[%s3846_s19 + $0x98] ss:$0 sps:$4 sm:$0x11]  }
  0x50   : > { %v854_v5 = vsel %vm818_vm0, %v852_v10, %v853_v21  ;;  %v1194_v44 = vshll.u32 %v3098_v40, 16  ;;  %v1192_v4 = vshrl.u32 %v3098_v40, 16  ;;  %v1190_v13 = vsel %vm545_vm1, %v1185_v34, %v1189_v36  ;;  %v4220_v49 = vld [vmem:[%s3846_s19 + $0x38] ss:$0 sps:$4 sm:$0x11]  }
  0x51   : > { %1907 = vrot.lane.b32.xlu1 %v1869_v35, %s3801_s4  ;;  %v4146_v35 = vld [vmem:[%s3846_s19 + $0x34] sm:$0xf]  ;;  %v1361_v8 = vrot.slane %v3129_v7, 1  ;;  %v1362_v21 = vrot.slane %v3551_v43, 1  ;;  %v3145_v2 = vcombine.low %v2995_v57, %v4185_v24  ;;  %v1603_v62 = vshll.u32 %v4220_v49, 16 }
  0x52   : > { %1891 = vrot.lane.b32.xlu0 %v1845_v41, %s3801_s4  ;;  %v1086_v41 = vshll.u32 %v3089_v29, 16  ;;  %v3090_v42 = vcombine.low %v2917_v33, %v4146_v35  ;;  %v1196_v59 = vrot.slane %v1194_v44, 1  ;;  %v4199_v33 = vld [vmem:[%s3846_s19 + $0xa0] sm:$0xf] }
  0x53   : > { %v1363_v37 = vsel %vm818_vm0, %v1361_v8, %v1362_v21  ;;  %v1694_v44 = vshll.u32 %v3145_v2, 16  ;;  %v1692_v56 = vshrl.u32 %v3145_v2, 16  ;;  %v1605_v8 = vrot.slane %v1603_v62, 1 }
  0x54   : > { %v1088_v50 = vrot.slane %v1086_v41, 1  ;;  %v1096_v3 = vshrl.u32 %v3090_v42, 16  ;;  %v1197_v16 = vor.u32 %v1196_v59, %v1192_v4  ;;  %v1699_v4 = vshll.u32 %v4214_v46, 16  ;;  %v4231_v59 = vld [vmem:[%s3846_s19 + $0x44] ss:$0 sps:$4 sm:$0x11]  }
  0x55   : > { %758 = vrot.lane.b32.xlu1 %v677_v48, %s3796_s22  ;;  %v1098_v48 = vshll.u32 %v3090_v42, 16  ;;  %v1696_v34 = vrot.slane %v1694_v44, 1  ;;  %v3034_v44 = vld [vmem:[%s3846_s19 + $0x9c] sm:$0xe] }
  0x56   : > { %742 = vrot.lane.b32.xlu0 %v581_v55, %s3796_s22  ;;  %v4165_v55 = vld [vmem:[%s3846_s19 + $0x38] ss:$0 sps:$4 sm:$0x11]  }
  0x57   : > { %v1103_v6 = vshll.u32 %v4165_v55, 16  ;;  %v1341_v43 = vrot.slane %v4165_v55, 1  ;;  %v3033_v55 = vld [vmem:[%s3846_s19 + $0x90] sm:$0xe] }
  0x58   : > { %v3177_v7 = vcombine.low %v3033_v55, %v4185_v24  ;;  %v1850_v55 = vrot.slane %v4220_v49, 1 }
  0x59   : > { %1909 = vrot.lane.b32.xlu1 %v1872_v58, %s3801_s4  ;;  %v1089_v58 = vor.u32 %v1088_v50, %v1084_v47  ;;  %v1105_v20 = vrot.slane %v1103_v6, 1  ;;  %v3601_v6 = vld [vmem:[%s5156_s1 + $0x10] ss:$0 sps:$4 sm:$0x33]  }
  0x5a   : > { %1893 = vrot.lane.b32.xlu0 %v1848_v60, %s3801_s4  ;;  %v1100_v60 = vrot.slane %v1098_v48, 1  ;;  %3460 = vmatprep.subr.msk.bf16.mxu0 %vm2247_vm2, %v3601_v6 }
  0x5b   : > { %v1094_v17 = vsel %vm545_vm1, %v1089_v58, %v1093_v0  ;;  %v4228_v58 = vld [vmem:[%s3846_s19 + $0xa4] ss:$0 sps:$4 sm:$0x11]   ;;  %v247_v0 = vld [vmem:[%s3846_s19 + $0x90] sm:$0xf]  ;;  %3461 = vmatprep.subr.msk.bf16.mxu1 %vm2247_vm2, %v3601_v6 }
  0x5c   : > { %v1101_v19 = vor.u32 %v1100_v60, %v1096_v3  ;;  %v4237_v60 = vld [vmem:[%s3846_s19 + $0x94] sm:$0xf] }
  0x5d   : > { %760 = vrot.lane.b32.xlu1 %v689_v39, %s3796_s22  ;;  %v1201_v39 = vrot.slane %v1199_v1, 1  ;;  %v4252_v57 = vcombine.low %v247_v0, %v4237_v60 }
  0x5e   : > { %744 = vrot.lane.b32.xlu0 %v593_v22, %s3796_s22  ;;  %v2962_v22 = vld [vmem:[%s3846_s19 + $0x30] sm:$0xe]  ;;  %v1106_v30 = vsel %vm545_vm1, %v1101_v19, %v1105_v20  ;;  %v1711_v19 = vshll.u32 %v4228_v58, 16 }
  0x5f   : > { %v1202_v10 = vsel %vm545_vm1, %v1197_v16, %v1201_v39  ;;  %v4245_v16 = vld [vmem:[%s3846_s19 + $0x34] sm:$0xf]  ;;  %v1701_v39 = vrot.slane %v1699_v4, 1  ;;  %v3025_v20 = vld [vmem:[%s3846_s19 + $0x30] sm:$0xe]  ;;  %5163 = vst [vmem:[#allocation2_spill] sm:$0xff] %v4252_v57 }
  0x61   : > { %887 = vrot.lane.b32.xlu1 %v851_v27, %s3795_s21  ;;  %v1338_v27 = vrot.slane %v4156_v14, 1  ;;  %v2981_v14 = vld [vmem:[%s3846_s19 + $0x3c] sm:$0xf] }
  0x62   : > { %871 = vrot.lane.b32.xlu0 %v827_v26, %s3795_s21  ;;  %v2979_v26 = vld [vmem:[%s3846_s19 + $0x30] sm:$0xf]  ;;  %v3138_v53 = vcombine.low %v2981_v14, %v4211_v45  ;;  %v4276_v14 = vld [vmem:[%s3846_s19 + $0xa0] sm:$0xf] }
  0x64   : > { %v1610_v3 = vshll.u32 %v3138_v53, 16 }
  0x65   : > { %889 = vrot.lane.b32.xlu1 %v854_v5, %s3795_s21  ;;  %v3137_v5 = vcombine.low %v2979_v26, %v4194_v15  ;;  %v4261_v26 = vld [vmem:[%s3846_s19 + $0x98] ss:$0 sps:$4 sm:$0x11]  }
  0x66   : > { %873 = vrot.lane.b32.xlu0 %v830_v9, %s3795_s21  ;;  %v3146_v9 = vcombine.low %v2997_v11, %v4199_v33  ;;  %v1612_v24 = vrot.slane %v1610_v3, 1  ;;  %v1873_v11 = vrot.slane %v3177_v7, 1  ;;  %v698_v4 = vshll.u32 %v4261_v26, 16 }
  0x67   : > { %v1598_v48 = vshll.u32 %v3137_v5, 16  ;;  %v1596_v36 = vshrl.u32 %v3137_v5, 16  ;;  %v3178_v7 = vcombine.low %v3034_v44, %v4199_v33 }
  0x68   : > { %v1704_v12 = vshrl.u32 %v3146_v9, 16 }
  0x69   : > { %999 = vrot.lane.b32.xlu1 %v3097_v25, %s3794_s20  ;;  %v1337_v25 = vrot.slane %v3121_v63, 1  ;;  %v1600_v1 = vrot.slane %v1598_v48, 1  ;;  %v1697_v63 = vor.u32 %v1696_v34, %v1692_v56  ;;  %v4281_v48 = vld [vmem:[%s3846_s19 + $0x40] sm:$0xf]  ;;  %v691_v56 = vshrl.u32 %v4252_v57, 16 }
  0x6a   : > { %983 = vrot.lane.b32.xlu0 %v3089_v29, %s3794_s20  ;;  %v3122_v29 = vcombine.low %v2962_v22, %v4146_v35  ;;  %v1364_v35 = vrot.slane %v3130_v61, 1  ;;  %v1608_v61 = vshrl.u32 %v3138_v53, 16 }
  0x6b   : > { %v1339_v41 = vsel %vm818_vm0, %v1337_v25, %v1338_v27  ;;  %v1601_v22 = vor.u32 %v1600_v1, %v1596_v36  ;;  %v2249_v25 = vsel %vm2247_vm2, %v3601_v6, 0  ;;  %v3169_v27 = vcombine.low %v3025_v20, %v4194_v15 }
  0x6c   : > { %3421 = vmatpush3.bf16.msra.mxu0 %v2249_v25  ;;  %3459 = vmatpush3.bf16.msra.mxu1 %v2249_v25  ;;  %v693_v15 = vshll.u32 %v4252_v57, 16  ;;  %v1877_v25 = vrot.slane %v4228_v58, 1 }
  0x6d   : > { %1001 = vrot.lane.b32.xlu1 %v3098_v40, %s3794_s20  ;;  %v1365_v40 = vrot.slane %v4161_v52, 1  ;;  %v1706_v52 = vshll.u32 %v3146_v9, 16 }
  0x6e   : > { %985 = vrot.lane.b32.xlu0 %v3090_v42, %s3794_s20  ;;  %v1340_v42 = vrot.slane %v3122_v29, 1  ;;  %v695_v34 = vrot.slane %v693_v15, 1  ;;  %v283_v15 = vld [vmem:[%s3846_s19 + $0x90] sm:$0xe] }
  0x6f   : > { %v1366_v47 = vsel %vm818_vm0, %v1364_v35, %v1365_v40  ;;  %v4268_v35 = vld [vmem:[%s3846_s19 + $0x38] ss:$0 sps:$4 sm:$0x11]   ;;  %v1606_v40 = vsel %vm545_vm1, %v1601_v22, %v1605_v8 }
  0x70   : > { %v1342_v50 = vsel %vm818_vm0, %v1340_v42, %v1341_v43  ;;  %v602_v36 = vshll.u32 %v4268_v35, 16 }
  0x71   : > { %1271 = vrot.lane.b32.xlu1 %v1190_v13, %s3797_s23  ;;  %v231_v13 = vld [vmem:[%s3846_s19 + $0x30] sm:$0xf] }
  0x72   : > { %1255 = vrot.lane.b32.xlu0 %v1094_v17, %s3797_s23  ;;  %v1708_v17 = vrot.slane %v1706_v52, 1  ;;  %v4256_v21 = vcombine.low %v231_v13, %v4245_v16  ;;  %v696_v13 = vor.u32 %v695_v34, %v691_v56 }
  0x74   : > { %5164 = vst [vmem:[#allocation3_spill] sm:$0xff] %v4256_v21  ;;  %v1709_v29 = vor.u32 %v1708_v17, %v1704_v12  ;;  %v597_v43 = vshll.u32 %v4256_v21, 16  ;;  %v595_v0 = vshrl.u32 %v4256_v21, 16  ;;  %v604_v17 = vrot.slane %v602_v36, 1 }
  0x75   : > { %1273 = vrot.lane.b32.xlu1 %v1202_v10, %s3797_s23  ;;  %v1615_v10 = vshll.u32 %v4231_v59, 16 }
  0x76   : > { %1257 = vrot.lane.b32.xlu0 %v1106_v30, %s3797_s23  ;;  %v1713_v30 = vrot.slane %v1711_v19, 1  ;;  %v599_v3 = vrot.slane %v597_v43, 1  ;;  %v4309_v19 = vld [vmem:[%s3846_s19 + $0xa4] ss:$0 sps:$4 sm:$0x11]  }
  0x77   : > { %v1617_v42 = vrot.slane %v1615_v10, 1  ;;  %v1876_v10 = vrot.slane %v3178_v7, 1  ;;  %v275_v43 = vld [vmem:[%s3846_s19 + $0x30] sm:$0xe] }
  0x78   : > { %v1714_v52 = vsel %vm545_vm1, %v1709_v29, %v1713_v30  ;;  %v600_v8 = vor.u32 %v599_v3, %v595_v0  ;;  %v1853_v29 = vrot.slane %v4231_v59, 1  ;;  %v3075_v34 = vcombine.low %v275_v43, %v4245_v16  ;;  %v2935_v3 = vld [vmem:[%s3846_s19 + $0x9c] sm:$0xf] }
  0x79   : > { %1399 = vrot.lane.b32.xlu1 %v1363_v37, %s3798_s24  ;;  %v1874_v37 = vrot.slane %v4214_v46, 1  ;;  %v3026_v46 = vld [vmem:[%s3846_s19 + $0x3c] sm:$0xe]  ;;  %v1878_v44 = vsel %vm818_vm0, %v1876_v10, %v1877_v25  ;;  %v856_v0 = vrot.slane %v4261_v26, 1  ;;  %v2937_v25 = vld [vmem:[%s3846_s19 + $0xa8] sm:$0xf] }
  0x7a   : > { %1383 = vrot.lane.b32.xlu0 %v1339_v41, %s3798_s24  ;;  %v1613_v41 = vor.u32 %v1612_v24, %v1608_v61 }
  0x7b   : > { %v1875_v12 = vsel %vm818_vm0, %v1873_v11, %v1874_v37  ;;  %v710_v37 = vshll.u32 %v4309_v19, 16 }
  0x7c   : > { %v1618_v62 = vsel %vm545_vm1, %v1613_v41, %v1617_v42 }
  0x7d   : > { %1401 = vrot.lane.b32.xlu1 %v1366_v47, %s3798_s24  ;;  %v233_v47 = vld [vmem:[%s3846_s19 + $0x3c] sm:$0xf] }
  0x7e   : > { %1385 = vrot.lane.b32.xlu0 %v1342_v50, %s3798_s24  ;;  %v4299_v49 = vcombine.low %v233_v47, %v4281_v48 }
  0x80   : > { %5166 = vst [vmem:[#allocation5_spill] sm:$0xff] %v4299_v49  ;;  %v609_v61 = vshll.u32 %v4299_v49, 16  ;;  %v607_v41 = vshrl.u32 %v4299_v49, 16 }
  0x81   : > { %1511 = vrot.lane.b32.xlu1 %v3145_v2, %s3799_s27  ;;  %v1702_v2 = vsel %vm545_vm1, %v1697_v63, %v1701_v39  ;;  %v3170_v63 = vcombine.low %v3026_v46, %v4211_v45  ;;  %v700_v39 = vrot.slane %v698_v4, 1  ;;  %v4316_v45 = vld [vmem:[%s3846_s19 + $0x44] ss:$0 sps:$4 sm:$0x11]   ;;  %v712_v46 = vrot.slane %v710_v37, 1 }
  0x82   : > { %1495 = vrot.lane.b32.xlu0 %v3137_v5, %s3799_s27  ;;  %v611_v42 = vrot.slane %v609_v61, 1  ;;  %v614_v58 = vshll.u32 %v4316_v45, 16  ;;  %v284_v4 = vld [vmem:[%s3846_s19 + $0x9c] sm:$0xe] }
  0x83   : > { %v701_v30 = vsel %vm545_vm1, %v696_v13, %v700_v39  ;;  %v831_v39 = vrot.slane %v3075_v34, 1 }
  0x84   : > { %v616_v56 = vrot.slane %v614_v58, 1 }
  0x85   : > { %1513 = vrot.lane.b32.xlu1 %v3146_v9, %s3799_s27  ;;  %v249_v9 = vld [vmem:[%s3846_s19 + $0x9c] sm:$0xf] }
  0x86   : > { %1497 = vrot.lane.b32.xlu0 %v3138_v53, %s3799_s27  ;;  %v1849_v53 = vrot.slane %v3169_v27, 1  ;;  %v4294_v1 = vcombine.low %v249_v9, %v4276_v14  ;;  %v1852_v27 = vrot.slane %v3170_v63, 1  ;;  %v3083_v9 = vcombine.low %v283_v15, %v4237_v60  ;;  %v276_v60 = vld [vmem:[%s3846_s19 + $0x3c] sm:$0xe]  ;;  %v2921_v15 = vld [vmem:[%s3846_s19 + $0x48] sm:$0xf] }
  0x87   : > { %v3084_v63 = vcombine.low %v284_v4, %v4276_v14  ;;  %v3076_v26 = vcombine.low %v276_v60, %v4281_v48 }
  0x88   : > { %5165 = vst [vmem:[#allocation4_spill] sm:$0xff] %v4294_v1  ;;  %v705_v20 = vshll.u32 %v4294_v1, 16  ;;  %v1851_v33 = vsel %vm818_vm0, %v1849_v53, %v1850_v55  ;;  %v1854_v53 = vsel %vm818_vm0, %v1852_v27, %v1853_v29  ;;  %v612_v55 = vor.u32 %v611_v42, %v607_v41  ;;  %v4375_v27 = vld [vmem:[%s3846_s19 + $0xac] sm:$0xf] }
  0x89   : > { %v4271_v5 = vpop.permute.xlu1 %995  ;;  %1783 = vrot.lane.b32.xlu1 %v1702_v2, %s3800_s30  ;;  %v703_v2 = vshrl.u32 %v4294_v1, 16  ;;  %v858_v10 = vrot.slane %v3084_v63, 1  ;;  %v3100_v41 = vcombine.low %v2937_v25, %v4375_v27  ;;  %v4390_v42 = vld [vmem:[%s3846_s19 + $0xa4] ss:$0 sps:$4 sm:$0x11]  }
  0x8a   : > { %v4285_v50 = vpop.permute.xlu0 %979  ;;  %1767 = vrot.lane.b32.xlu0 %v1606_v40, %s3800_s30  ;;  %v707_v11 = vrot.slane %v705_v20, 1  ;;  %v605_v40 = vsel %vm545_vm1, %v600_v8, %v604_v17  ;;  %v617_v13 = vsel %vm545_vm1, %v612_v55, %v616_v56  ;;  %v832_v17 = vrot.slane %v4268_v35, 1  ;;  %v2919_v20 = vld [vmem:[%s3846_s19 + $0x3c] sm:$0xf] }
  0x8b   : > { %v859_v35 = vrot.slane %v4309_v19, 1  ;;  %v1218_v55 = vshll.u32 %v3100_v41, 16  ;;  %v1211_v34 = vshll.u32 %v4390_v42, 16  ;;  %v4413_v63 = vld [vmem:[%s3846_s19 + $0x50] ss:$0 sps:$4 sm:$0x11]  }
  0x8c   : > { %v708_v47 = vor.u32 %v707_v11, %v703_v2  ;;  %v834_v2 = vrot.slane %v3076_v26, 1  ;;  %v835_v11 = vrot.slane %v4316_v45, 1  ;;  %v2971_v26 = vld [vmem:[%s3846_s19 + $0x9c] sm:$0xe] }
  0x8d   : > { %v4301_v6 = vpop.permute.xlu1 %883  ;;  %1785 = vrot.lane.b32.xlu1 %v1714_v52, %s3800_s30  ;;  %v860_v58 = vsel %vm818_vm0, %v858_v10, %v859_v35  ;;  %v1220_v10 = vrot.slane %v1218_v55, 1  ;;  %v2963_v25 = vld [vmem:[%s3846_s19 + $0x3c] sm:$0xe] }
  0x8e   : > { %1769 = vrot.lane.b32.xlu0 %v1618_v62, %s3800_s30  ;;  %v855_v62 = vrot.slane %v3083_v9, 1  ;;  %v713_v7 = vsel %vm545_vm1, %v708_v47, %v712_v46  ;;  %v4395_v9 = vld [vmem:[%s3846_s19 + $0x44] ss:$0 sps:$4 sm:$0x11]  }
  0x8f   : > { %v4312_v22 = vpop.permute.xlu0 %867 }
  0x90   : > { %v857_v61 = vsel %vm818_vm0, %v855_v62, %v856_v0  ;;  %v4407_v62 = vld [vmem:[%s3846_s19 + $0xb0] ss:$0 sps:$4 sm:$0x11]  }
  0x91   : > { %1911 = vrot.lane.b32.xlu1 %v1875_v12, %s3801_s4  ;;  %v4354_v12 = vld [vmem:[%s3846_s19 + $0xa0] sm:$0xf]  ;;  %v1223_v35 = vshll.u32 %v4407_v62, 16 }
  0x92   : > { %v4320_v24 = vpop.permute.xlu1 %885  ;;  %1895 = vrot.lane.b32.xlu0 %v1851_v33, %s3801_s4  ;;  %v4363_v33 = vld [vmem:[%s3846_s19 + $0x40] sm:$0xf]  ;;  %v3099_v14 = vcombine.low %v2935_v3, %v4354_v12 }
  0x93   : > { %v3091_v48 = vcombine.low %v2919_v20, %v4363_v33  ;;  %v1213_v20 = vrot.slane %v1211_v34, 1  ;;  %v1225_v34 = vrot.slane %v1223_v35, 1 }
  0x94   : > { %v4332_v59 = vpop.permute.xlu0 %869  ;;  %v1206_v19 = vshll.u32 %v3099_v14, 16 }
  0x95   : > { %762 = vrot.lane.b32.xlu1 %v701_v30, %s3796_s22  ;;  %v833_v30 = vsel %vm818_vm0, %v831_v39, %v832_v17  ;;  %v1110_v43 = vshll.u32 %v3091_v48, 16  ;;  %v1108_v4 = vshrl.u32 %v3091_v48, 16  ;;  %v1216_v17 = vshrl.u32 %v3100_v41, 16 }
  0x96   : > { %746 = vrot.lane.b32.xlu0 %v605_v40, %s3796_s22  ;;  %v4385_v40 = vld [vmem:[%s3846_s19 + $0x4c] sm:$0xf]  ;;  %v1208_v56 = vrot.slane %v1206_v19, 1 }
  0x97   : > { %v4339_v52 = vpop.permute.xlu1 %740  ;;  %v3092_v47 = vcombine.low %v2921_v15, %v4385_v40  ;;  %v1112_v60 = vrot.slane %v1110_v43, 1  ;;  %v1127_v15 = vshll.u32 %v4413_v63, 16  ;;  %v4429_v43 = vld [vmem:[%s3846_s19 + $0xac] sm:$0xf] }
  0x98   : > { %v4344_v36 = vpop.permute.xlu0 %738 }
  0x99   : > { %1913 = vrot.lane.b32.xlu1 %v1878_v44, %s3801_s4  ;;  %v836_v44 = vsel %vm818_vm0, %v834_v2, %v835_v11  ;;  %v1122_v3 = vshll.u32 %v3092_v47, 16  ;;  %v1120_v11 = vshrl.u32 %v3092_v47, 16 }
  0x9a   : > { %1897 = vrot.lane.b32.xlu0 %v1854_v53, %s3801_s4  ;;  %v1204_v53 = vshrl.u32 %v3099_v14, 16 }
  0x9b   : > { %v4356_v16 = vpop.permute.xlu1 %756 }
  0x9c   : > { %v4365_v8 = vpop.permute.xlu0 %754  ;;  %v1209_v39 = vor.u32 %v1208_v56, %v1204_v53  ;;  %v2972_v53 = vld [vmem:[%s3846_s19 + $0xa8] sm:$0xe]  ;;  %v1221_v56 = vor.u32 %v1220_v10, %v1216_v17  ;;  %v4455_v10 = vld [vmem:[%s3846_s19 + $0xb8] sm:$0xf] }
  0x9d   : > { %764 = vrot.lane.b32.xlu1 %v713_v7, %s3796_s22  ;;  %v1115_v7 = vshll.u32 %v4395_v9, 16  ;;  %v3132_v17 = vcombine.low %v2972_v53, %v4375_v27  ;;  %v4463_v27 = vld [vmem:[%s3846_s19 + $0x58] sm:$0xf] }
  0x9e   : > { %748 = vrot.lane.b32.xlu0 %v617_v13, %s3796_s22  ;;  %v1214_v55 = vsel %vm545_vm1, %v1209_v39, %v1213_v20  ;;  %v4448_v39 = vld [vmem:[%s3846_s19 + $0x4c] sm:$0xf]  ;;  %v1368_v20 = vrot.slane %v4390_v42, 1 }
  0x9f   : > { %v4377_v29 = vpop.permute.xlu1 %997  ;;  %v1117_v2 = vrot.slane %v1115_v7, 1  ;;  %v1129_v7 = vrot.slane %v1127_v15, 1 }
  0xa0   : > { %v4381_v37 = vpop.permute.xlu0 %981 }
  0xa1   : > { %891 = vrot.lane.b32.xlu1 %v857_v61, %s3795_s21  ;;  %v1113_v61 = vor.u32 %v1112_v60, %v1108_v4  ;;  %v2964_v4 = vld [vmem:[%s3846_s19 + $0x48] sm:$0xe] }
  0xa2   : > { %875 = vrot.lane.b32.xlu0 %v833_v30, %s3795_s21  ;;  %v3124_v35 = vcombine.low %v2964_v4, %v4385_v40  ;;  %v4473_v40 = vld [vmem:[%s3846_s19 + $0xb0] ss:$0 sps:$4 sm:$0x11]   ;;  %v1371_v4 = vrot.slane %v4407_v62, 1 }
  0xa3   : > { %v4397_v45 = vpop.permute.xlu1 %1267 }
  0xa4   : > { %v4401_v46 = vpop.permute.xlu0 %1251 }
  0xa5   : > { %893 = vrot.lane.b32.xlu1 %v860_v58, %s3795_s21  ;;  %v2999_v58 = vld [vmem:[%s3846_s19 + $0xa8] sm:$0xf] }
  0xa6   : > { %877 = vrot.lane.b32.xlu0 %v836_v44, %s3795_s21  ;;  %v3123_v44 = vcombine.low %v2963_v25, %v4363_v33  ;;  %v1226_v25 = vsel %vm545_vm1, %v1221_v56, %v1225_v34 }
  0xa7   : > { %v4409_v0 = vpop.permute.xlu1 %1269 }
  0xa8   : > { %v4415_v13 = vpop.permute.xlu0 %1253 }
  0xa9   : > { %1003 = vrot.lane.b32.xlu1 %v3099_v14, %s3794_s20  ;;  %v1124_v14 = vrot.slane %v1122_v3, 1  ;;  %v1118_v3 = vsel %vm545_vm1, %v1113_v61, %v1117_v2  ;;  %v3001_v61 = vld [vmem:[%s3846_s19 + $0xb4] sm:$0xf]  ;;  %v1343_v2 = vrot.slane %v3123_v44, 1 }
  0xaa   : > { %987 = vrot.lane.b32.xlu0 %v3091_v48, %s3794_s20  ;;  %v3131_v48 = vcombine.low %v2971_v26, %v4354_v12  ;;  %v4478_v44 = vcombine.low %v3001_v61, %v4455_v10 }
  0xab   : > { %v4422_v30 = vpop.permute.xlu1 %1395  ;;  %v1125_v12 = vor.u32 %v1124_v14, %v1120_v11  ;;  %v1344_v11 = vrot.slane %v4395_v9, 1  ;;  %v2985_v14 = vld [vmem:[%s3846_s19 + $0x54] sm:$0xf] }
  0xac   : > { %v4425_v19 = vpop.permute.xlu0 %1379  ;;  %v1367_v26 = vrot.slane %v3131_v48, 1  ;;  %v4483_v56 = vcombine.low %v2985_v14, %v4463_v27  ;;  %v1730_v62 = vshll.u32 %v4478_v44, 16 }
  0xad   : > { %1005 = vrot.lane.b32.xlu1 %v3100_v41, %s3794_s20  ;;  %v4442_v41 = vcombine.low %v2999_v58, %v4429_v43  ;;  %v1130_v58 = vsel %vm545_vm1, %v1125_v12, %v1129_v7  ;;  %v1345_v34 = vsel %vm818_vm0, %v1343_v2, %v1344_v11  ;;  %v1347_v12 = vrot.slane %v4413_v63, 1  ;;  %v4498_v63 = vld [vmem:[%s3846_s19 + $0x50] ss:$0 sps:$4 sm:$0x11]  }
  0xae   : > { %989 = vrot.lane.b32.xlu0 %v3092_v47, %s3794_s20  ;;  %v2983_v47 = vld [vmem:[%s3846_s19 + $0x48] sm:$0xf]  ;;  %v1369_v9 = vsel %vm818_vm0, %v1367_v26, %v1368_v20  ;;  %v1723_v20 = vshll.u32 %v4473_v40, 16  ;;  %v4506_v2 = vld [vmem:[%s3846_s19 + $0xbc] ss:$0 sps:$4 sm:$0x11]   ;;  %v1925_v11 = vsel %vm1923_vm3, %v3883_v23, %v4344_v36 }
  0xaf   : > { %v4438_v60 = vpop.permute.xlu1 %1397  ;;  %v1718_v42 = vshll.u32 %v4442_v41, 16  ;;  %v4470_v48 = vcombine.low %v2983_v47, %v4448_v39 }
  0xb0   : > { %v4444_v33 = vpop.permute.xlu0 %1381  ;;  %v1725_v1 = vrot.slane %v1723_v20, 1 }
  0xb1   : > { %1275 = vrot.lane.b32.xlu1 %v1214_v55, %s3797_s23  ;;  %v1370_v55 = vrot.slane %v3132_v17, 1  ;;  %v1622_v47 = vshll.u32 %v4470_v48, 16  ;;  %v1716_v17 = vshrl.u32 %v4442_v41, 16  ;;  %v1720_v26 = vrot.slane %v1718_v42, 1 }
  0xb2   : > { %1259 = vrot.lane.b32.xlu0 %v1118_v3, %s3797_s23  ;;  %v1346_v3 = vrot.slane %v3124_v35, 1  ;;  %v1941_v35 = vsel %vm1923_vm3, %v3878_v18, %v4365_v8  ;;  %v3035_v18 = vld [vmem:[%s3846_s19 + $0xa8] sm:$0xe]  ;;  %v4516_v8 = vld [vmem:[%s3846_s19 + $0x5c] ss:$0 sps:$4 sm:$0x11]  }
  0xb3   : > { %v4465_v15 = vpop.permute.xlu1 %1507  ;;  %v1372_v14 = vsel %vm818_vm0, %v1370_v55, %v1371_v4  ;;  %v1721_v49 = vor.u32 %v1720_v26, %v1716_v17  ;;  %v1620_v21 = vshrl.u32 %v4470_v48, 16  ;;  %v1624_v57 = vrot.slane %v1622_v47, 1 }
  0xb4   : > { %v4475_v53 = vpop.permute.xlu0 %1491  ;;  %v1974_v23 = vsel %vm1956_vm4, %v1941_v35, %v4301_v6  ;;  %v1728_v55 = vshrl.u32 %v4478_v44, 16  ;;  %v1732_v4 = vrot.slane %v1730_v62, 1  ;;  %v1632_v47 = vshrl.u32 %v4483_v56, 16 }
  0xb5   : > { %1277 = vrot.lane.b32.xlu1 %v1226_v25, %s3797_s23  ;;  %v1634_v25 = vshll.u32 %v4483_v56, 16  ;;  %v3179_v6 = vcombine.low %v3035_v18, %v4429_v43  ;;  %v1639_v20 = vshll.u32 %v4516_v8, 16  ;;  %v1726_v35 = vsel %vm545_vm1, %v1721_v49, %v1725_v1 }
  0xb6   : > { %1261 = vrot.lane.b32.xlu0 %v1130_v58, %s3797_s23  ;;  %v1348_v58 = vsel %vm818_vm0, %v1346_v3, %v1347_v12  ;;  %v1958_v3 = vsel %vm1956_vm4, %v1925_v11, %v4312_v22  ;;  %v1735_v12 = vshll.u32 %v4506_v2, 16  ;;  %v2007_v22 = vsel %vm1989_vm5, %v1974_v23, %v4271_v5  ;;  %v251_v11 = vld [vmem:[%s3846_s19 + $0xa8] sm:$0xf]  ;;  %v4550_v23 = vld [vmem:[%s3846_s19 + $0x4c] sm:$0xf] }
  0xb7   : > { %v4489_v7 = vpop.permute.xlu1 %1509  ;;  %v1636_v17 = vrot.slane %v1634_v25, 1  ;;  %v1625_v25 = vor.u32 %v1624_v57, %v1620_v21  ;;  %v2040_v43 = vsel %vm2022_vm6, %v2007_v22, %v4397_v45  ;;  %v235_v5 = vld [vmem:[%s3846_s19 + $0x48] sm:$0xf]  ;;  %v253_v22 = vld [vmem:[%s3846_s19 + $0xb4] sm:$0xf] }
  0xb8   : > { %v4494_v61 = vpop.permute.xlu0 %1493  ;;  %v2073_v57 = vsel %vm2055_vm7, %v2040_v43, %v4422_v30  ;;  %v1737_v21 = vrot.slane %v1735_v12, 1  ;;  %v1943_v30 = vsel %vm1923_vm3, %v3890_v31, %v4356_v16  ;;  %v1879_v31 = vrot.slane %v3179_v6, 1  ;;  %v4582_v16 = vld [vmem:[%s3846_s19 + $0xb0] ss:$0 sps:$4 sm:$0x11]  }
  0xb9   : > { %1403 = vrot.lane.b32.xlu1 %v1369_v9, %s3798_s24  ;;  %v3027_v9 = vld [vmem:[%s3846_s19 + $0x48] sm:$0xe]  ;;  %v1637_v49 = vor.u32 %v1636_v17, %v1632_v47  ;;  %v2106_v45 = vsel %vm2088_vm8, %v2073_v57, %v4465_v15  ;;  %v4574_v15 = vcombine.low %v235_v5, %v4550_v23  ;;  %v1976_v47 = vsel %vm1956_vm4, %v1943_v30, %v4320_v24 }
  0xba   : > { %1387 = vrot.lane.b32.xlu0 %v1345_v34, %s3798_s24  ;;  %v1627_v34 = vshll.u32 %v4498_v63, 16  ;;  %v3171_v26 = vcombine.low %v3027_v9, %v4448_v39  ;;  %v1991_v39 = vsel %vm1989_vm5, %v1958_v3, %v4285_v50  ;;  %v1733_v9 = vor.u32 %v1732_v4, %v1728_v55 }
  0xbb   : > { %v1780_v42 = vpop.permute.xlu1 %1779  ;;  %v2024_v1 = vsel %vm2022_vm6, %v1991_v39, %v4401_v46  ;;  %v1856_v17 = vrot.slane %v4498_v63, 1  ;;  %v722_v43 = vshll.u32 %v4582_v16, 16  ;;  %v237_v39 = vld [vmem:[%s3846_s19 + $0x54] sm:$0xf] }
  0xbc   : > { %v1764_v36 = vpop.permute.xlu0 %1763  ;;  %v1629_v18 = vrot.slane %v1627_v34, 1  ;;  %v2057_v50 = vsel %vm2055_vm7, %v2024_v1, %v4425_v19  ;;  %v1641_v34 = vrot.slane %v1639_v20, 1  ;;  %v2139_v19 = vsel %vm2121_vm9, %v2106_v45, %v1780_v42 }
  0xbd   : > { %1405 = vrot.lane.b32.xlu1 %v1372_v14, %s3798_s24  ;;  %v4540_v14 = vld [vmem:[%s3846_s19 + $0xac] sm:$0xf]  ;;  %v621_v20 = vshll.u32 %v4574_v15, 16 }
  0xbe   : > { %1389 = vrot.lane.b32.xlu0 %v1348_v58, %s3798_s24  ;;  %v4565_v46 = vcombine.low %v251_v11, %v4540_v14  ;;  %v1630_v42 = vsel %vm545_vm1, %v1625_v25, %v1629_v18  ;;  %v4611_v25 = vld [vmem:[%s3846_s19 + $0xb8] sm:$0xf] }
  0xbf   : > { %v4535_v62 = vpop.permute.xlu1 %1781  ;;  %v4623_v18 = vld [vmem:[%s3846_s19 + $0x58] sm:$0xf] }
  0xc0   : > { %v4546_v58 = vpop.permute.xlu0 %1765  ;;  %v717_v6 = vshll.u32 %v4565_v46, 16 }
  0xc1   : > { %1515 = vrot.lane.b32.xlu1 %v4442_v41, %s3799_s27  ;;  %v2090_v41 = vsel %vm2088_vm8, %v2057_v50, %v4475_v53  ;;  %v4640_v50 = vcombine.low %v253_v22, %v4611_v25 }
  0xc2   : > { %1499 = vrot.lane.b32.xlu0 %v4470_v48, %s3799_s27  ;;  %v1927_v48 = vsel %vm1923_vm3, %v3896_v38, %v4339_v52  ;;  %v2123_v4 = vsel %vm2121_vm9, %v2090_v41, %v1764_v36  ;;  %v1880_v38 = vrot.slane %v4473_v40, 1  ;;  %v1855_v52 = vrot.slane %v3171_v26, 1  ;;  %v4591_v36 = vld [vmem:[%s3846_s19 + $0x50] ss:$0 sps:$4 sm:$0x11]  }
  0xc3   : > { %v1908_v55 = vpop.permute.xlu1 %1907  ;;  %v2009_v40 = vsel %vm1989_vm5, %v1976_v47, %v4377_v29  ;;  %v1960_v26 = vsel %vm1956_vm4, %v1927_v48, %v4332_v59  ;;  %v715_v59 = vshrl.u32 %v4565_v46, 16  ;;  %v724_v48 = vrot.slane %v722_v43, 1  ;;  %v277_v43 = vld [vmem:[%s3846_s19 + $0x48] sm:$0xe] }
  0xc4   : > { %v1892_v3 = vpop.permute.xlu0 %1891  ;;  %v2172_v12 = vsel %vm2154_vm10, %v2139_v19, %v1908_v55  ;;  %v1993_v63 = vsel %vm1989_vm5, %v1960_v26, %v4381_v37  ;;  %v2042_v29 = vsel %vm2022_vm6, %v2009_v40, %v4409_v0  ;;  %v619_v37 = vshrl.u32 %v4574_v15, 16 }
  0xc5   : > { %1517 = vrot.lane.b32.xlu1 %v4478_v44, %s3799_s27  ;;  %v2156_v53 = vsel %vm2154_vm10, %v2123_v4, %v1892_v3  ;;  %3438 = vmatprep.mubr.msk.bf16.mxu1 %vm2214_vm11, %v2172_v12  ;;  %v1738_v44 = vsel %vm545_vm1, %v1733_v9, %v1737_v21  ;;  %v2026_v9 = vsel %vm2022_vm6, %v1993_v63, %v4415_v13  ;;  %v626_v0 = vshll.u32 %v4591_v36, 16  ;;  %v3036_v21 = vld [vmem:[%s3846_s19 + $0xb4] sm:$0xe]  ;;  %v4661_v4 = vld [vmem:[%s3846_s19 + $0xbc] ss:$0 sps:$4 sm:$0x11]  }
  0xc6   : > { %1501 = vrot.lane.b32.xlu0 %v4483_v56, %s3799_s27  ;;  %3422 = vmatprep.mubr.msk.bf16.mxu0 %vm2214_vm11, %v2156_v53  ;;  %v1642_v56 = vsel %vm545_vm1, %v1637_v49, %v1641_v34  ;;  %v2075_v5 = vsel %vm2055_vm7, %v2042_v29, %v4438_v60  ;;  %v2059_v1 = vsel %vm2055_vm7, %v2026_v9, %v4444_v33  ;;  %v3028_v49 = vld [vmem:[%s3846_s19 + $0x54] sm:$0xe]  ;;  %v719_v13 = vrot.slane %v717_v6, 1 }
  0xc7   : > { %v4605_v24 = vpop.permute.xlu1 %758  ;;  %v2108_v57 = vsel %vm2088_vm8, %v2075_v5, %v4489_v7  ;;  %v2092_v60 = vsel %vm2088_vm8, %v2059_v1, %v4494_v61  ;;  %v623_v33 = vrot.slane %v621_v20, 1  ;;  %v4647_v34 = vcombine.low %v237_v39, %v4623_v18 }
  0xc8   : > { %v4617_v11 = vpop.permute.xlu0 %742  ;;  %v2125_v7 = vsel %vm2121_vm9, %v2092_v60, %v4546_v58  ;;  %v3180_v19 = vcombine.low %v3036_v21, %v4455_v10  ;;  %v3172_v61 = vcombine.low %v3028_v49, %v4463_v27  ;;  %v720_v58 = vor.u32 %v719_v13, %v715_v59  ;;  %v286_v13 = vld [vmem:[%s3846_s19 + $0xb4] sm:$0xe] }
  0xc9   : > { %1787 = vrot.lane.b32.xlu1 %v1726_v35, %s3800_s30  ;;  %v2141_v35 = vsel %vm2121_vm9, %v2108_v57, %v4535_v62  ;;  %v1881_v62 = vsel %vm818_vm0, %v1879_v31, %v1880_v38  ;;  %v729_v10 = vshll.u32 %v4640_v50, 16  ;;  %v1857_v27 = vsel %vm818_vm0, %v1855_v52, %v1856_v17 }
  0xca   : > { %1771 = vrot.lane.b32.xlu0 %v1630_v42, %s3800_s30  ;;  %v624_v12 = vor.u32 %v623_v33, %v619_v37  ;;  %v628_v53 = vrot.slane %v626_v0, 1  ;;  %v4668_v42 = vld [vmem:[%s3846_s19 + $0x5c] ss:$0 sps:$4 sm:$0x11]   ;;  %v633_v47 = vshll.u32 %v4647_v34, 16  ;;  %v1882_v31 = vrot.slane %v3180_v19, 1 }
  0xcb   : > { %v1910_v45 = vpop.permute.xlu1 %1909  ;;  %v1883_v38 = vrot.slane %v4506_v2, 1  ;;  %v1858_v6 = vrot.slane %v3172_v61, 1  ;;  %v1859_v40 = vrot.slane %v4516_v8, 1  ;;  %v725_v52 = vsel %vm545_vm1, %v720_v58, %v724_v48  ;;  %v285_v8 = vld [vmem:[%s3846_s19 + $0xa8] sm:$0xe] }
  0xcc   : > { %v2174_v30 = vsel %vm2154_vm10, %v2141_v35, %v1910_v45  ;;  %v1894_v41 = vpop.permute.xlu0 %1893  ;;  %v727_v17 = vshrl.u32 %v4640_v50, 16  ;;  %v731_v26 = vrot.slane %v729_v10, 1  ;;  %v629_v22 = vsel %vm545_vm1, %v624_v12, %v628_v53  ;;  %v278_v35 = vld [vmem:[%s3846_s19 + $0x54] sm:$0xe] }
  0xcd   : > { %v2158_v55 = vsel %vm2154_vm10, %v2125_v7, %v1894_v41  ;;  %1789 = vrot.lane.b32.xlu1 %v1738_v44, %s3800_s30  ;;  %3439 = vmatmul.mubr.msk.bf16.vlgmr.msra.gmra.mrb[0].mxu1 %vm2214_vm11, %v2174_v30  ;;  %v631_v63 = vshrl.u32 %v4647_v34, 16  ;;  %v635_v29 = vrot.slane %v633_v47, 1  ;;  %v638_v2 = vshll.u32 %v4668_v42, 16  ;;  %v2923_v48 = vld [vmem:[%s3846_s19 + $0x54] sm:$0xf] }
  0xce   : > { %1773 = vrot.lane.b32.xlu0 %v1642_v56, %s3800_s30  ;;  %3423 = vmatmul.mubr.msk.bf16.vlgmr.msra.gmra.mrb[0].mxu0 %vm2214_vm11, %v2158_v55  ;;  %v734_v56 = vshll.u32 %v4661_v4, 16  ;;  %v1884_v39 = vsel %vm818_vm0, %v1882_v31, %v1883_v38  ;;  %v732_v9 = vor.u32 %v731_v26, %v727_v17  ;;  %v3085_v37 = vcombine.low %v285_v8, %v4540_v14  ;;  %v2939_v55 = vld [vmem:[%s3846_s19 + $0xb4] sm:$0xf]  ;;  %v2941_v38 = vld [vmem:[%s3846_s19 + $0xc0] sm:$0xf] }
  0xcf   : > { %v4664_v3 = vpop.permute.xlu1 %760  ;;  %v1860_v1 = vsel %vm818_vm0, %v1858_v6, %v1859_v40  ;;  %v636_v57 = vor.u32 %v635_v29, %v631_v63  ;;  %v640_v21 = vrot.slane %v638_v2, 1  ;;  %v3077_v49 = vcombine.low %v277_v43, %v4550_v23  ;;  %v4733_v6 = vld [vmem:[%s3846_s19 + $0xc4] sm:$0xf] }
  0xd0   : > { %v4671_v44 = vpop.permute.xlu0 %744  ;;  %v736_v5 = vrot.slane %v734_v56, 1  ;;  %v861_v45 = vrot.slane %v3085_v37, 1  ;;  %v862_v33 = vrot.slane %v4582_v16, 1  ;;  %v3086_v7 = vcombine.low %v286_v13, %v4611_v25  ;;  %v4719_v16 = vld [vmem:[%s3846_s19 + $0x58] sm:$0xf] }
  0xd1   : > { %1915 = vrot.lane.b32.xlu1 %v1881_v62, %s3801_s4  ;;  %v641_v23 = vsel %vm545_vm1, %v636_v57, %v640_v21  ;;  %v837_v41 = vrot.slane %v3077_v49, 1  ;;  %v838_v19 = vrot.slane %v4591_v36, 1  ;;  %v3078_v61 = vcombine.low %v278_v35, %v4623_v18  ;;  %v4713_v62 = vld [vmem:[%s3846_s19 + $0xb8] sm:$0xf]  ;;  %v4739_v17 = vld [vmem:[%s3846_s19 + $0x64] sm:$0xf] }
  0xd2   : > { %1899 = vrot.lane.b32.xlu0 %v1857_v27, %s3801_s4  ;;  %v737_v14 = vsel %vm545_vm1, %v732_v9, %v736_v5  ;;  %v863_v36 = vsel %vm818_vm0, %v861_v45, %v862_v33  ;;  %v864_v25 = vrot.slane %v3086_v7, 1  ;;  %v865_v18 = vrot.slane %v4661_v4, 1  ;;  %v4743_v4 = vld [vmem:[%s3846_s19 + $0xbc] ss:$0 sps:$4 sm:$0x11]  }
  0xd3   : > { %v4680_v20 = vpop.permute.xlu1 %887  ;;  %v3101_v10 = vcombine.low %v2939_v55, %v4713_v62  ;;  %v839_v12 = vsel %vm818_vm0, %v837_v41, %v838_v19  ;;  %v840_v53 = vrot.slane %v3078_v61, 1  ;;  %v841_v47 = vrot.slane %v4668_v42, 1  ;;  %v4767_v35 = vld [vmem:[%s3846_s19 + $0x68] ss:$0 sps:$4 sm:$0x11]  }
  0xd4   : > { %v4686_v59 = vpop.permute.xlu0 %871  ;;  %v3093_v31 = vcombine.low %v2923_v48, %v4719_v16  ;;  %v866_v26 = vsel %vm818_vm0, %v864_v25, %v865_v18  ;;  %v3102_v42 = vcombine.low %v2941_v38, %v4733_v6  ;;  %v1235_v9 = vshll.u32 %v4743_v4, 16 }
  0xd5   : > { %766 = vrot.lane.b32.xlu1 %v725_v52, %s3796_s22  ;;  %v2925_v52 = vld [vmem:[%s3846_s19 + $0x60] sm:$0xf]  ;;  %v1230_v56 = vshll.u32 %v3101_v10, 16  ;;  %v842_v29 = vsel %vm818_vm0, %v840_v53, %v841_v47  ;;  %v1151_v18 = vshll.u32 %v4767_v35, 16  ;;  %v2965_v53 = vld [vmem:[%s3846_s19 + $0x54] sm:$0xe] }
  0xd6   : > { %750 = vrot.lane.b32.xlu0 %v629_v22, %s3796_s22  ;;  %v4749_v22 = vld [vmem:[%s3846_s19 + $0x5c] ss:$0 sps:$4 sm:$0x11]   ;;  %v3094_v2 = vcombine.low %v2925_v52, %v4739_v17  ;;  %v1134_v8 = vshll.u32 %v3093_v31, 16  ;;  %v1242_v57 = vshll.u32 %v3102_v42, 16  ;;  %v1132_v49 = vshrl.u32 %v3093_v31, 16 }
  0xd7   : > { %v4693_v0 = vpop.permute.xlu1 %889  ;;  %v1232_v5 = vrot.slane %v1230_v56, 1  ;;  %v1139_v37 = vshll.u32 %v4749_v22, 16  ;;  %v1237_v33 = vrot.slane %v1235_v9, 1  ;;  %v1240_v7 = vshrl.u32 %v3102_v42, 16  ;;  %v2974_v9 = vld [vmem:[%s3846_s19 + $0xc0] sm:$0xe] }
  0xd8   : > { %v4698_v60 = vpop.permute.xlu0 %873  ;;  %v1136_v13 = vrot.slane %v1134_v8, 1  ;;  %v1244_v19 = vrot.slane %v1242_v57, 1  ;;  %v1153_v8 = vrot.slane %v1151_v18, 1 }
  0xd9   : > { %1917 = vrot.lane.b32.xlu1 %v1884_v39, %s3801_s4  ;;  %v1228_v39 = vshrl.u32 %v3101_v10, 16  ;;  %v1141_v41 = vrot.slane %v1139_v37, 1  ;;  %v4795_v37 = vld [vmem:[%s3846_s19 + $0xc4] sm:$0xf] }
  0xda   : > { %1901 = vrot.lane.b32.xlu0 %v1860_v1, %s3801_s4  ;;  %v4762_v1 = vld [vmem:[%s3846_s19 + $0xc8] ss:$0 sps:$4 sm:$0x11]   ;;  %v1137_v48 = vor.u32 %v1136_v13, %v1132_v49  ;;  %v3134_v13 = vcombine.low %v2974_v9, %v4733_v6 }
  0xdb   : > { %v4706_v30 = vpop.permute.xlu1 %999  ;;  %v1247_v61 = vshll.u32 %v4762_v1, 16  ;;  %v1377_v18 = vrot.slane %v4762_v1, 1 }
  0xdc   : > { %v4715_v58 = vpop.permute.xlu0 %983  ;;  %v1142_v56 = vsel %vm545_vm1, %v1137_v48, %v1141_v41  ;;  %v3005_v48 = vld [vmem:[%s3846_s19 + $0xcc] sm:$0xf] }
  0xdd   : > { %768 = vrot.lane.b32.xlu1 %v737_v14, %s3796_s22  ;;  %v1146_v14 = vshll.u32 %v3094_v2, 16  ;;  %v1249_v38 = vrot.slane %v1247_v61, 1 }
  0xde   : > { %752 = vrot.lane.b32.xlu0 %v641_v23, %s3796_s22  ;;  %v1233_v23 = vor.u32 %v1232_v5, %v1228_v39  ;;  %v3125_v39 = vcombine.low %v2965_v53, %v4719_v16  ;;  %v3003_v5 = vld [vmem:[%s3846_s19 + $0xc0] sm:$0xf]  ;;  %v1350_v16 = vrot.slane %v4749_v22, 1  ;;  %v4818_v22 = vld [vmem:[%s3846_s19 + $0xd0] sm:$0xf] }
  0xdf   : > { %v4726_v27 = vpop.permute.xlu1 %1001  ;;  %v1148_v25 = vrot.slane %v1146_v14, 1  ;;  %v2987_v14 = vld [vmem:[%s3846_s19 + $0x60] sm:$0xf] }
  0xe0   : > { %v4735_v40 = vpop.permute.xlu0 %985  ;;  %v1238_v47 = vsel %vm545_vm1, %v1233_v23, %v1237_v33  ;;  %v4805_v33 = vld [vmem:[%s3846_s19 + $0x64] sm:$0xf]  ;;  %v1349_v41 = vrot.slane %v3125_v39, 1  ;;  %v4840_v39 = vld [vmem:[%s3846_s19 + $0x68] ss:$0 sps:$4 sm:$0x11]  }
  0xe1   : > { %895 = vrot.lane.b32.xlu1 %v863_v36, %s3795_s21  ;;  %v1144_v36 = vshrl.u32 %v3094_v2, 16  ;;  %v3141_v6 = vcombine.low %v2987_v14, %v4805_v33  ;;  %v1651_v14 = vshll.u32 %v4840_v39, 16 }
  0xe2   : > { %879 = vrot.lane.b32.xlu0 %v839_v12, %s3795_s21  ;;  %v2973_v12 = vld [vmem:[%s3846_s19 + $0xb4] sm:$0xe]  ;;  %v1351_v53 = vsel %vm818_vm0, %v1349_v41, %v1350_v16  ;;  %v1945_v41 = vsel %vm1923_vm3, %v4034_v51, %v4605_v24 }
  0xe3   : > { %v4751_v63 = vpop.permute.xlu1 %1271  ;;  %v3133_v52 = vcombine.low %v2973_v12, %v4713_v62  ;;  %v1374_v62 = vrot.slane %v4743_v4, 1  ;;  %v1646_v9 = vshll.u32 %v3141_v6, 16 }
  0xe4   : > { %v4755_v43 = vpop.permute.xlu0 %1255 }
  0xe5   : > { %897 = vrot.lane.b32.xlu1 %v866_v26, %s3795_s21  ;;  %v1373_v49 = vrot.slane %v3133_v52, 1 }
  0xe6   : > { %881 = vrot.lane.b32.xlu0 %v842_v29, %s3795_s21  ;;  %v1149_v29 = vor.u32 %v1148_v25, %v1144_v36  ;;  %v4821_v36 = vld [vmem:[%s3846_s19 + $0xc8] ss:$0 sps:$4 sm:$0x11]   ;;  %v1376_v25 = vrot.slane %v3134_v13, 1 }
  0xe7   : > { %v4764_v21 = vpop.permute.xlu1 %1273  ;;  %v1747_v1 = vshll.u32 %v4821_v36, 16 }
  0xe8   : > { %v4769_v45 = vpop.permute.xlu0 %1257  ;;  %v1154_v23 = vsel %vm545_vm1, %v1149_v29, %v1153_v8  ;;  %v4834_v29 = vcombine.low %v3005_v48, %v4818_v22  ;;  %v4837_v8 = vld [vmem:[%s3846_s19 + $0x70] sm:$0xf]  ;;  %v1644_v48 = vshrl.u32 %v3141_v6, 16 }
  0xe9   : > { %1007 = vrot.lane.b32.xlu1 %v3101_v10, %s3794_s20 }
  0xea   : > { %991 = vrot.lane.b32.xlu0 %v3093_v31, %s3794_s20  ;;  %v1245_v31 = vor.u32 %v1244_v19, %v1240_v7  ;;  %v3149_v19 = vcombine.low %v3003_v5, %v4795_v37 }
  0xeb   : > { %v4774_v55 = vpop.permute.xlu1 %1399 }
  0xec   : > { %v4778_v10 = vpop.permute.xlu0 %1383  ;;  %v1250_v57 = vsel %vm545_vm1, %v1245_v31, %v1249_v38  ;;  %v1353_v31 = vrot.slane %v4767_v35, 1  ;;  %v2989_v38 = vld [vmem:[%s3846_s19 + $0x6c] sm:$0xf]  ;;  %v1742_v52 = vshll.u32 %v3149_v19, 16  ;;  %v1378_v35 = vsel %vm818_vm0, %v1376_v25, %v1377_v18 }
  0xed   : > { %1009 = vrot.lane.b32.xlu1 %v3102_v42, %s3794_s20  ;;  %v1929_v25 = vsel %vm1923_vm3, %v4037_v54, %v4617_v11  ;;  %v1978_v18 = vsel %vm1956_vm4, %v1945_v41, %v4680_v20 }
  0xee   : > { %993 = vrot.lane.b32.xlu0 %v3094_v2, %s3794_s20  ;;  %v2966_v2 = vld [vmem:[%s3846_s19 + $0x60] sm:$0xe]  ;;  %v1744_v16 = vrot.slane %v1742_v52, 1  ;;  %v1962_v51 = vsel %vm1956_vm4, %v1929_v25, %v4686_v59  ;;  %v2011_v24 = vsel %vm1989_vm5, %v1978_v18, %v4706_v30 }
  0xef   : > { %v4785_v26 = vpop.permute.xlu1 %1401  ;;  %v3126_v4 = vcombine.low %v2966_v2, %v4739_v17  ;;  %v1375_v17 = vsel %vm818_vm0, %v1373_v49, %v1374_v62  ;;  %v4847_v2 = vld [vmem:[%s3846_s19 + $0xd4] ss:$0 sps:$4 sm:$0x11]   ;;  %v1740_v49 = vshrl.u32 %v3149_v19, 16  ;;  %v1995_v20 = vsel %vm1989_vm5, %v1962_v51, %v4715_v58  ;;  %v3037_v58 = vld [vmem:[%s3846_s19 + $0xc0] sm:$0xe] }
  0xf0   : > { %v4790_v42 = vpop.permute.xlu0 %1385  ;;  %v2044_v52 = vsel %vm2022_vm6, %v2011_v24, %v4751_v63  ;;  %v2028_v59 = vsel %vm2022_vm6, %v1995_v20, %v4755_v43  ;;  %v3030_v24 = vld [vmem:[%s3846_s19 + $0x6c] sm:$0xe] }
  0xf1   : > { %1279 = vrot.lane.b32.xlu1 %v1238_v47, %s3797_s23  ;;  %v1352_v47 = vrot.slane %v3126_v4, 1  ;;  %v1749_v4 = vrot.slane %v1747_v1, 1  ;;  %v1745_v54 = vor.u32 %v1744_v16, %v1740_v49  ;;  %v2077_v30 = vsel %vm2055_vm7, %v2044_v52, %v4774_v55 }
  0xf2   : > { %1263 = vrot.lane.b32.xlu0 %v1142_v56, %s3797_s23  ;;  %v2061_v63 = vsel %vm2055_vm7, %v2028_v59, %v4778_v10 }
  0xf3   : > { %v4807_v7 = vpop.permute.xlu1 %1511  ;;  %v1354_v62 = vsel %vm818_vm0, %v1352_v47, %v1353_v31  ;;  %v1759_v47 = vshll.u32 %v4847_v2, 16  ;;  %v4868_v31 = vld [vmem:[%s3846_s19 + $0x74] ss:$0 sps:$4 sm:$0x11]   ;;  %v1750_v41 = vsel %vm545_vm1, %v1745_v54, %v1749_v4  ;;  %v1931_v4 = vsel %vm1923_vm3, %v4080_v32, %v4671_v44 }
  0xf4   : > { %v4812_v61 = vpop.permute.xlu0 %1495  ;;  %v2110_v16 = vsel %vm2088_vm8, %v2077_v30, %v4807_v7  ;;  %v1663_v43 = vshll.u32 %v4868_v31, 16 }
  0xf5   : > { %1281 = vrot.lane.b32.xlu1 %v1250_v57, %s3797_s23  ;;  %v4851_v57 = vcombine.low %v2989_v38, %v4837_v8  ;;  %v2094_v55 = vsel %vm2088_vm8, %v2061_v63, %v4812_v61  ;;  %v1947_v61 = vsel %vm1923_vm3, %v4075_v28, %v4664_v3  ;;  %v1964_v3 = vsel %vm1956_vm4, %v1931_v4, %v4698_v60 }
  0xf6   : > { %1265 = vrot.lane.b32.xlu0 %v1154_v23, %s3797_s23  ;;  %v1754_v23 = vshll.u32 %v4834_v29, 16  ;;  %v1665_v44 = vrot.slane %v1663_v43, 1  ;;  %v1886_v60 = vrot.slane %v4821_v36, 1 }
  0xf7   : > { %v4826_v12 = vpop.permute.xlu1 %1513  ;;  %v1658_v11 = vshll.u32 %v4851_v57, 16  ;;  %v1656_v49 = vshrl.u32 %v4851_v57, 16 }
  0xf8   : > { %v4831_v56 = vpop.permute.xlu0 %1497 }
  0xf9   : > { %1407 = vrot.lane.b32.xlu1 %v1375_v17, %s3798_s24  ;;  %v1648_v17 = vrot.slane %v1646_v9, 1  ;;  %v1653_v9 = vrot.slane %v1651_v14, 1  ;;  %v1761_v14 = vrot.slane %v1759_v47, 1  ;;  %v3038_v47 = vld [vmem:[%s3846_s19 + $0xcc] sm:$0xe] }
  0xfa   : > { %1391 = vrot.lane.b32.xlu0 %v1351_v53, %s3798_s24  ;;  %v1752_v53 = vshrl.u32 %v4834_v29, 16  ;;  %v3182_v52 = vcombine.low %v3038_v47, %v4818_v22 }
  0xfb   : > { %v1784_v5 = vpop.permute.xlu1 %1783 }
  0xfc   : > { %v1768_v13 = vpop.permute.xlu0 %1767 }
  0xfd   : > { %1409 = vrot.lane.b32.xlu1 %v1378_v35, %s3798_s24  ;;  %v1756_v35 = vrot.slane %v1754_v23, 1  ;;  %v2127_v10 = vsel %vm2121_vm9, %v2094_v55, %v1768_v13 }
  0xfe   : > { %1393 = vrot.lane.b32.xlu0 %v1354_v62, %s3798_s24  ;;  %v1649_v62 = vor.u32 %v1648_v17, %v1644_v48  ;;  %v1660_v48 = vrot.slane %v1658_v11, 1  ;;  %v3029_v17 = vld [vmem:[%s3846_s19 + $0x60] sm:$0xe] }
  0xff   : > { %v4874_v38 = vpop.permute.xlu1 %1785  ;;  %v1757_v18 = vor.u32 %v1756_v35, %v1752_v53  ;;  %v3173_v28 = vcombine.low %v3029_v17, %v4805_v33  ;;  %v3174_v35 = vcombine.low %v3030_v24, %v4837_v8  ;;  %v1889_v8 = vrot.slane %v4847_v2, 1 }
 0x100   : > { %v4881_v1 = vpop.permute.xlu0 %1769  ;;  %v1654_v13 = vsel %vm545_vm1, %v1649_v62, %v1653_v9  ;;  %v1661_v32 = vor.u32 %v1660_v48, %v1656_v49  ;;  %v1865_v49 = vrot.slane %v4868_v31, 1 }
 0x101   : > { %1519 = vrot.lane.b32.xlu1 %v3149_v19, %s3799_s27  ;;  %v2143_v19 = vsel %vm2121_vm9, %v2110_v16, %v1784_v5  ;;  %v1762_v33 = vsel %vm545_vm1, %v1757_v18, %v1761_v14  ;;  %v1861_v36 = vrot.slane %v3173_v28, 1  ;;  %v1864_v62 = vrot.slane %v3174_v35, 1 }
 0x102   : > { %1503 = vrot.lane.b32.xlu0 %v3141_v6, %s3799_s27  ;;  %v3181_v6 = vcombine.low %v3037_v58, %v4795_v37  ;;  %v1980_v37 = vsel %vm1956_vm4, %v1947_v61, %v4693_v0  ;;  %v1997_v0 = vsel %vm1989_vm5, %v1964_v3, %v4735_v40  ;;  %v1862_v40 = vrot.slane %v4840_v39, 1 }
 0x103   : > { %v1912_v23 = vpop.permute.xlu1 %1911  ;;  %v1666_v39 = vsel %vm545_vm1, %v1661_v32, %v1665_v44  ;;  %v1866_v14 = vsel %vm818_vm0, %v1864_v62, %v1865_v49  ;;  %v5168_v44 = vld [vmem:[#allocation3_spill] sm:$0xff] }
 0x104   : > { %v2176_v25 = vsel %vm2154_vm10, %v2143_v19, %v1912_v23  ;;  %v1896_v7 = vpop.permute.xlu0 %1895  ;;  %v1885_v11 = vrot.slane %v3181_v6, 1 }
 0x105   : > { %v2160_v5 = vsel %vm2154_vm10, %v2127_v10, %v1896_v7  ;;  %1521 = vrot.lane.b32.xlu1 %v4834_v29, %s3799_s27  ;;  %3442 = vmatprep.mubr.msk.bf16.mxu1 %vm2214_vm11, %v2176_v25  ;;  %v2013_v29 = vsel %vm1989_vm5, %v1980_v37, %v4726_v27  ;;  %v2030_v27 = vsel %vm2022_vm6, %v1997_v0, %v4769_v45 }
 0x106   : > { %1505 = vrot.lane.b32.xlu0 %v4851_v57, %s3799_s27  ;;  %3426 = vmatprep.mubr.msk.bf16.mxu0 %vm2214_vm11, %v2160_v5  ;;  %v2046_v57 = vsel %vm2022_vm6, %v2013_v29, %v4764_v21  ;;  %v2063_v21 = vsel %vm2055_vm7, %v2030_v27, %v4790_v42  ;;  %v1887_v22 = vsel %vm818_vm0, %v1885_v11, %v1886_v60  ;;  %v5167_v29 = vld [vmem:[#allocation2_spill] sm:$0xff] }
 0x107   : > { %v4925_v53 = vpop.permute.xlu1 %762  ;;  %v2079_v54 = vsel %vm2055_vm7, %v2046_v57, %v4785_v26  ;;  %v2096_v45 = vsel %vm2088_vm8, %v2063_v21, %v4831_v56  ;;  %v1888_v56 = vrot.slane %v3182_v52, 1 }
 0x108   : > { %v4932_v51 = vpop.permute.xlu0 %746  ;;  %v2112_v20 = vsel %vm2088_vm8, %v2079_v54, %v4826_v12  ;;  %v2129_v42 = vsel %vm2121_vm9, %v2096_v45, %v4881_v1  ;;  %v1863_v1 = vsel %vm818_vm0, %v1861_v36, %v1862_v40  ;;  %v1949_v32 = vsel %vm1923_vm3, %v5167_v29, %v4925_v53 }
 0x109   : > { %1791 = vrot.lane.b32.xlu1 %v1750_v41, %s3800_s30  ;;  %v2145_v26 = vsel %vm2121_vm9, %v2112_v20, %v4874_v38  ;;  %v1890_v63 = vsel %vm818_vm0, %v1888_v56, %v1889_v8  ;;  %v1933_v47 = vsel %vm1923_vm3, %v5168_v44, %v4932_v51 }
 0x10a   : > { %1775 = vrot.lane.b32.xlu0 %v1654_v13, %s3800_s30 }
 0x10b   : > { %v1914_v9 = vpop.permute.xlu1 %1913 }
 0x10c   : > { %v2178_v12 = vsel %vm2154_vm10, %v2145_v26, %v1914_v9  ;;  %v1898_v59 = vpop.permute.xlu0 %1897  ;;  %v5169_v9 = vld [vmem:[#allocation4_spill] sm:$0xff] }
 0x10d   : > { %v2162_v30 = vsel %vm2154_vm10, %v2129_v42, %v1898_v59  ;;  %1793 = vrot.lane.b32.xlu1 %v1762_v33, %s3800_s30  ;;  %3443 = vmatmul.mubr.msk.bf16.gmra.mrb[4].mxu1 %vm2214_vm11, %v2178_v12  ;;  %v5170_v42 = vld [vmem:[#allocation5_spill] sm:$0xff] }
 0x10e   : > { %1777 = vrot.lane.b32.xlu0 %v1666_v39, %s3800_s30  ;;  %3427 = vmatmul.mubr.msk.bf16.gmra.mrb[4].mxu0 %vm2214_vm11, %v2162_v30 }
 0x10f   : > { %v765_v38 = vpop.permute.xlu1 %764 }
 0x110   : > { %v749_v58 = vpop.permute.xlu0 %748  ;;  %v1951_v39 = vsel %vm1923_vm3, %v5169_v9, %v765_v38 }
 0x111   : > { %1919 = vrot.lane.b32.xlu1 %v1887_v22, %s3801_s4  ;;  %v1935_v12 = vsel %vm1923_vm3, %v5170_v42, %v749_v58 }
 0x112   : > { %1903 = vrot.lane.b32.xlu0 %v1863_v1, %s3801_s4 }
 0x113   : > { %v892_v16 = vpop.permute.xlu1 %891 }
 0x114   : > { %v876_v43 = vpop.permute.xlu0 %875  ;;  %v1982_v0 = vsel %vm1956_vm4, %v1949_v32, %v892_v16 }
 0x115   : > { %1921 = vrot.lane.b32.xlu1 %v1890_v63, %s3801_s4  ;;  %v1966_v57 = vsel %vm1956_vm4, %v1933_v47, %v876_v43 }
 0x116   : > { %1905 = vrot.lane.b32.xlu0 %v1866_v14, %s3801_s4 }
 0x117   : > { %v894_v2 = vpop.permute.xlu1 %893 }
 0x118   : > { %v878_v55 = vpop.permute.xlu0 %877  ;;  %v1984_v59 = vsel %vm1956_vm4, %v1951_v39, %v894_v2 }
 0x119   : > { %v1968_v30 = vsel %vm1956_vm4, %v1935_v12, %v878_v55 }
 0x11b   : > { %v1004_v19 = vpop.permute.xlu1 %1003 }
 0x11c   : > { %v988_v23 = vpop.permute.xlu0 %987  ;;  %v2015_v33 = vsel %vm1989_vm5, %v1982_v0, %v1004_v19 }
 0x11d   : > { %v1999_v24 = vsel %vm1989_vm5, %v1966_v57, %v988_v23 }
 0x11f   : > { %v1006_v31 = vpop.permute.xlu1 %1005 }
 0x120   : > { %v990_v41 = vpop.permute.xlu0 %989  ;;  %v2017_v22 = vsel %vm1989_vm5, %v1984_v59, %v1006_v31 }
 0x121   : > { %v2001_v8 = vsel %vm1989_vm5, %v1968_v30, %v990_v41 }
 0x123   : > { %v1276_v48 = vpop.permute.xlu1 %1275 }
 0x124   : > { %v1260_v17 = vpop.permute.xlu0 %1259  ;;  %v2048_v27 = vsel %vm2022_vm6, %v2015_v33, %v1276_v48 }
 0x125   : > { %v2032_v11 = vsel %vm2022_vm6, %v1999_v24, %v1260_v17 }
 0x127   : > { %v1278_v10 = vpop.permute.xlu1 %1277 }
 0x128   : > { %v1262_v25 = vpop.permute.xlu0 %1261  ;;  %v2050_v38 = vsel %vm2022_vm6, %v2017_v22, %v1278_v10 }
 0x129   : > { %v2034_v62 = vsel %vm2022_vm6, %v2001_v8, %v1262_v25 }
 0x12b   : > { %v1404_v7 = vpop.permute.xlu1 %1403 }
 0x12c   : > { %v1388_v18 = vpop.permute.xlu0 %1387  ;;  %v2081_v53 = vsel %vm2055_vm7, %v2048_v27, %v1404_v7 }
 0x12d   : > { %v2065_v40 = vsel %vm2055_vm7, %v2032_v11, %v1388_v18 }
 0x12f   : > { %v1406_v6 = vpop.permute.xlu1 %1405 }
 0x130   : > { %v1390_v61 = vpop.permute.xlu0 %1389  ;;  %v2083_v49 = vsel %vm2055_vm7, %v2050_v38, %v1406_v6 }
 0x131   : > { %v2067_v58 = vsel %vm2055_vm7, %v2034_v62, %v1390_v61 }
 0x133   : > { %v1516_v5 = vpop.permute.xlu1 %1515 }
 0x134   : > { %v1500_v13 = vpop.permute.xlu0 %1499  ;;  %v2114_v51 = vsel %vm2088_vm8, %v2081_v53, %v1516_v5 }
 0x135   : > { %v2098_v21 = vsel %vm2088_vm8, %v2065_v40, %v1500_v13 }
 0x137   : > { %v1518_v4 = vpop.permute.xlu1 %1517 }
 0x138   : > { %v1502_v37 = vpop.permute.xlu0 %1501  ;;  %v2116_v63 = vsel %vm2088_vm8, %v2083_v49, %v1518_v4 }
 0x139   : > { %v2100_v16 = vsel %vm2088_vm8, %v2067_v58, %v1502_v37 }
 0x13b   : > { %v1788_v28 = vpop.permute.xlu1 %1787 }
 0x13c   : > { %v1772_v3 = vpop.permute.xlu0 %1771  ;;  %v2147_v20 = vsel %vm2121_vm9, %v2114_v51, %v1788_v28 }
 0x13d   : > { %v2131_v52 = vsel %vm2121_vm9, %v2098_v21, %v1772_v3 }
 0x13f   : > { %v1790_v60 = vpop.permute.xlu1 %1789 }
 0x140   : > { %v1774_v54 = vpop.permute.xlu0 %1773  ;;  %v2149_v14 = vsel %vm2121_vm9, %v2116_v63, %v1790_v60 }
 0x141   : > { %v2133_v2 = vsel %vm2121_vm9, %v2100_v16, %v1774_v54 }
 0x143   : > { %v1916_v36 = vpop.permute.xlu1 %1915 }
 0x144   : > { %v2180_v45 = vsel %vm2154_vm10, %v2147_v20, %v1916_v36  ;;  %v1900_v26 = vpop.permute.xlu0 %1899 }
 0x145   : > { %v2164_v35 = vsel %vm2154_vm10, %v2131_v52, %v1900_v26  ;;  %3446 = vmatprep.mubr.msk.bf16.mxu1 %vm2214_vm11, %v2180_v45 }
 0x146   : > { %3430 = vmatprep.mubr.msk.bf16.mxu0 %vm2214_vm11, %v2164_v35 }
 0x147   : > { %v767_v56 = vpop.permute.xlu1 %766 }
 0x148   : > { %v751_v1 = vpop.permute.xlu0 %750  ;;  %v1953_v24 = vsel %vm1923_vm3, %v4565_v46, %v767_v56 }
 0x149   : > { %v1937_v27 = vsel %vm1923_vm3, %v4574_v15, %v751_v1 }
 0x14b   : > { %v1918_v43 = vpop.permute.xlu1 %1917 }
 0x14c   : > { %v2182_v55 = vsel %vm2154_vm10, %v2149_v14, %v1918_v43  ;;  %v1902_v19 = vpop.permute.xlu0 %1901 }
 0x14d   : > { %v2166_v23 = vsel %vm2154_vm10, %v2133_v2, %v1902_v19  ;;  %3447 = vmatmul.mubr.msk.bf16.gmra.mrb[8].mxu1 %vm2214_vm11, %v2182_v55  ;;  %v5058_v19 = vld [vmem:[%s5157_s2] ss:$0 sm:$0xff] }
 0x14e   : > { %3431 = vmatmul.mubr.msk.bf16.gmra.mrb[8].mxu0 %vm2214_vm11, %v2166_v23 }
 0x14f   : > { %v769_v31 = vpop.permute.xlu1 %768 }
 0x150   : > { %v753_v41 = vpop.permute.xlu0 %752  ;;  %v1955_v36 = vsel %vm1923_vm3, %v4640_v50, %v769_v31 }
 0x151   : > { %v1939_v15 = vsel %vm1923_vm3, %v4647_v34, %v753_v41 }
 0x153   : > { %v896_v48 = vpop.permute.xlu1 %895 }
 0x154   : > { %v880_v17 = vpop.permute.xlu0 %879  ;;  %v1986_v54 = vsel %vm1956_vm4, %v1953_v24, %v896_v48 }
 0x155   : > { %v1970_v11 = vsel %vm1956_vm4, %v1937_v27, %v880_v17 }
 0x157   : > { %v898_v10 = vpop.permute.xlu1 %897 }
 0x158   : > { %v882_v25 = vpop.permute.xlu0 %881  ;;  %v1988_v45 = vsel %vm1956_vm4, %v1955_v36, %v898_v10 }
 0x159   : > { %v1972_v39 = vsel %vm1956_vm4, %v1939_v15, %v882_v25 }
 0x15b   : > { %v1008_v7 = vpop.permute.xlu1 %1007 }
 0x15c   : > { %v992_v18 = vpop.permute.xlu0 %991  ;;  %v2019_v53 = vsel %vm1989_vm5, %v1986_v54, %v1008_v7 }
 0x15d   : > { %v2003_v51 = vsel %vm1989_vm5, %v1970_v11, %v992_v18 }
 0x15f   : > { %v1010_v6 = vpop.permute.xlu1 %1009 }
 0x160   : > { %v994_v61 = vpop.permute.xlu0 %993  ;;  %v2021_v35 = vsel %vm1989_vm5, %v1988_v45, %v1010_v6 }
 0x161   : > { %v2005_v59 = vsel %vm1989_vm5, %v1972_v39, %v994_v61 }
 0x163   : > { %v1280_v5 = vpop.permute.xlu1 %1279 }
 0x164   : > { %v1264_v13 = vpop.permute.xlu0 %1263  ;;  %v2052_v21 = vsel %vm2022_vm6, %v2019_v53, %v1280_v5 }
 0x165   : > { %v2036_v46 = vsel %vm2022_vm6, %v2003_v51, %v1264_v13 }
 0x167   : > { %v1282_v4 = vpop.permute.xlu1 %1281 }
 0x168   : > { %v1266_v37 = vpop.permute.xlu0 %1265  ;;  %v2054_v30 = vsel %vm2022_vm6, %v2021_v35, %v1282_v4 }
 0x169   : > { %v2038_v8 = vsel %vm2022_vm6, %v2005_v59, %v1266_v37 }
 0x16b   : > { %v1408_v28 = vpop.permute.xlu1 %1407 }
 0x16c   : > { %v1392_v3 = vpop.permute.xlu0 %1391  ;;  %v2085_v52 = vsel %vm2055_vm7, %v2052_v21, %v1408_v28 }
 0x16d   : > { %v2069_v26 = vsel %vm2055_vm7, %v2036_v46, %v1392_v3 }
 0x16f   : > { %v1410_v29 = vpop.permute.xlu1 %1409 }
 0x170   : > { %v1394_v32 = vpop.permute.xlu0 %1393  ;;  %v2087_v38 = vsel %vm2055_vm7, %v2054_v30, %v1410_v29 }
 0x171   : > { %v2071_v62 = vsel %vm2055_vm7, %v2038_v8, %v1394_v32 }
 0x173   : > { %v1520_v44 = vpop.permute.xlu1 %1519 }
 0x174   : > { %v1504_v47 = vpop.permute.xlu0 %1503  ;;  %v2118_v9 = vsel %vm2088_vm8, %v2085_v52, %v1520_v44 }
 0x175   : > { %v2102_v42 = vsel %vm2088_vm8, %v2069_v26, %v1504_v47 }
 0x177   : > { %v1522_v0 = vpop.permute.xlu1 %1521 }
 0x178   : > { %v1506_v57 = vpop.permute.xlu0 %1505  ;;  %v2120_v49 = vsel %vm2088_vm8, %v2087_v38, %v1522_v0 }
 0x179   : > { %v2104_v58 = vsel %vm2088_vm8, %v2071_v62, %v1506_v57 }
 0x17b   : > { %v1792_v33 = vpop.permute.xlu1 %1791 }
 0x17c   : > { %v1776_v60 = vpop.permute.xlu0 %1775  ;;  %v2151_v50 = vsel %vm2121_vm9, %v2118_v9, %v1792_v33 }
 0x17d   : > { %v2135_v34 = vsel %vm2121_vm9, %v2102_v42, %v1776_v60 }
 0x17f   : > { %v1794_v40 = vpop.permute.xlu1 %1793 }
 0x180   : > { %v1778_v20 = vpop.permute.xlu0 %1777  ;;  %v2153_v63 = vsel %vm2121_vm9, %v2120_v49, %v1794_v40 }
 0x181   : > { %v2137_v14 = vsel %vm2121_vm9, %v2104_v58, %v1778_v20 }
 0x183   : > { %v1920_v12 = vpop.permute.xlu1 %1919 }
 0x184   : > { %v2184_v22 = vsel %vm2154_vm10, %v2151_v50, %v1920_v12  ;;  %v1904_v56 = vpop.permute.xlu0 %1903 }
 0x185   : > { %v2168_v1 = vsel %vm2154_vm10, %v2135_v34, %v1904_v56  ;;  %3450 = vmatprep.mubr.msk.bf16.mxu1 %vm2214_vm11, %v2184_v22 }
 0x186   : > { %3434 = vmatprep.mubr.msk.bf16.mxu0 %vm2214_vm11, %v2168_v1 }
 0x187   : > { %v1922_v16 = vpop.permute.xlu1 %1921 }
 0x188   : > { %v2186_v43 = vsel %vm2154_vm10, %v2153_v63, %v1922_v16  ;;  %v1906_v2 = vpop.permute.xlu0 %1905 }
 0x189   : > { %v2170_v55 = vsel %vm2154_vm10, %v2137_v14, %v1906_v2  ;;  %3451 = vmatmul.mubr.msk.bf16.gmra.mrb[12].mxu1 %vm2214_vm11, %v2186_v43 }
 0x18a   : > { %3435 = vmatmul.mubr.msk.bf16.gmra.mrb[12].mxu0 %vm2214_vm11, %v2170_v55 }
 0x1a0   : > { %v3440_v23 = vpop.f32.mrb[0].mxu1 }
 0x1a1   : > { %v3424_v31 = vpop.f32.mrb[0].mxu0  ;;  %v5061_v41 = vadd.f32 %v3440_v23, %v5058_v19  ;;  %v2349_v48 = vpop.f32.mrb[1].mxu1 }
 0x1a2   : > { %v2294_v17 = vadd.f32 %v3424_v31, %v5058_v19  ;;  %v2285_v10 = vpop.f32.mrb[1].mxu0  ;;  %v5065_v25 = vadd.f32 %v5058_v19, %v2349_v48  ;;  %v3441_v7 = vpop.f32.mrb[2].mxu1 }
 0x1a3   : > { %v3221_v18 = vmul.f32 -1.442695, %v5061_v41  ;;  %v2286_v6 = vadd.f32 %v5058_v19, %v2285_v10  ;;  %v3425_v61 = vpop.f32.mrb[2].mxu0  ;;  %v2361_v5 = vadd.f32 %v3441_v7, %v5058_v19  ;;  %v2352_v13 = vpop.f32.mrb[3].mxu1 }
 0x1a4   : > { %v3205_v4 = vmul.f32 -1.442695, %v2294_v17  ;;  %v3219_v37 = vmul.f32 -1.442695, %v5065_v25  ;;  %v2297_v28 = vadd.f32 %v3425_v61, %v5058_v19  ;;  %v2288_v3 = vpop.f32.mrb[3].mxu0  ;;  %v2353_v29 = vadd.f32 %v5058_v19, %v2352_v13 }
 0x1a5   : > { %3642 = vpow2.f32 %v3221_v18  ;;  %v3203_v32 = vmul.f32 -1.442695, %v2286_v6  ;;  %v2289_v44 = vadd.f32 %v5058_v19, %v2288_v3  ;;  %v3222_v0 = vmul.f32 -1.442695, %v2361_v5 }
 0x1a6   : > { %3644 = vpow2.f32 %v3205_v4  ;;  %v3206_v47 = vmul.f32 -1.442695, %v2297_v28  ;;  %v3220_v33 = vmul.f32 -1.442695, %v2353_v29 }
 0x1a7   : > { %3646 = vpow2.f32 %v3203_v32  ;;  %v3204_v57 = vmul.f32 -1.442695, %v2289_v44 }
 0x1a8   : > { %3648 = vpow2.f32 %v3219_v37 }
 0x1a9   : > { %3650 = vpow2.f32 %v3206_v47 }
 0x1aa   : > { %3652 = vpow2.f32 %v3222_v0 }
 0x1ab   : > { %3654 = vpow2.f32 %v3204_v57 }
 0x1ac   : > { %3656 = vpow2.f32 %v3220_v33 }
 0x1af   : > { %v3643_v60 = vpop.eup %3642 }
 0x1b0   : > { %v3645_v24 = vpop.eup %3644  ;;  %v2526_v27 = vadd.f32 1.0, %v3643_v60 }
 0x1b1   : > { %v3647_v54 = vpop.eup %3646  ;;  %v2510_v11 = vadd.f32 1.0, %v3645_v24 }
 0x1b2   : > { %v3649_v53 = vpop.eup %3648  ;;  %3658 = vrcp.f32 %v2526_v27  ;;  %v2508_v40 = vadd.f32 1.0, %v3647_v54 }
 0x1b3   : > { %v3651_v51 = vpop.eup %3650  ;;  %3660 = vrcp.f32 %v2510_v11  ;;  %v2524_v21 = vadd.f32 1.0, %v3649_v53 }
 0x1b4   : > { %v3653_v20 = vpop.eup %3652  ;;  %3662 = vrcp.f32 %v2508_v40  ;;  %v2511_v36 = vadd.f32 1.0, %v3651_v51 }
 0x1b5   : > { %v3655_v46 = vpop.eup %3654  ;;  %3664 = vrcp.f32 %v2524_v21  ;;  %v2527_v52 = vadd.f32 1.0, %v3653_v20 }
 0x1b6   : > { %v3657_v15 = vpop.eup %3656  ;;  %3666 = vrcp.f32 %v2511_v36  ;;  %v2509_v45 = vadd.f32 1.0, %v3655_v46 }
 0x1b7   : > { %3668 = vrcp.f32 %v2527_v52  ;;  %v2525_v26 = vadd.f32 1.0, %v3657_v15 }
 0x1b8   : > { %3670 = vrcp.f32 %v2509_v45 }
 0x1b9   : > { %3672 = vrcp.f32 %v2525_v26 }
 0x1bc   : > { %v3659_v9 = vpop.eup %3658 }
 0x1bd   : > { %v3661_v39 = vpop.eup %3660  ;;  %v2622_v22 = vmul.f32 %v3659_v9, %v5061_v41 }
 0x1be   : > { %v3663_v35 = vpop.eup %3662  ;;  %v2606_v59 = vmul.f32 %v3661_v39, %v2294_v17 }
 0x1bf   : > { %v3665_v42 = vpop.eup %3664  ;;  %v2604_v38 = vmul.f32 %v3663_v35, %v2286_v6 }
 0x1c0   : > { %v3667_v50 = vpop.eup %3666  ;;  %v2620_v49 = vmul.f32 %v3665_v42, %v5065_v25 }
 0x1c1   : > { %v3669_v12 = vpop.eup %3668  ;;  %v2607_v30 = vmul.f32 %v3667_v50, %v2297_v28 }
 0x1c2   : > { %v3671_v34 = vpop.eup %3670  ;;  %v2623_v56 = vmul.f32 %v3669_v12, %v2361_v5 }
 0x1c3   : > { %v3673_v8 = vpop.eup %3672  ;;  %v3310_v1 = vpack.c.bf16 %v2607_v30, %v2606_v59  ;;  %v2605_v62 = vmul.f32 %v3671_v34, %v2289_v44 }
 0x1c4   : > { %v3350_v58 = vpack.c.bf16 %v2623_v56, %v2622_v22  ;;  %v2621_v63 = vmul.f32 %v3673_v8, %v2353_v29 }
 0x1c5   : > { %3382 = vst [vmem:[%s5079_s16 + $0x8] sm:$0xff] %v3310_v1   ;;  %v3305_v16 = vpack.c.bf16 %v2605_v62, %v2604_v38 }
 0x1c6   : > { %3390 = vst [vmem:[%s5079_s16 + $0x48] sm:$0xff] %v3350_v58   ;;  %v3345_v14 = vpack.c.bf16 %v2621_v63, %v2620_v49 }
 0x1c7   : > { %3306 = vst [vmem:[%s5079_s16] sm:$0xff] %v3305_v16  }
 0x1c8   : > { %3389 = vst [vmem:[%s5079_s16 + $0x40] sm:$0xff] %v3345_v14  }
 0x1e0   : > { %v3444_v43 = vpop.f32.mrb[4].mxu1 }
 0x1e1   : > { %v3428_v2 = vpop.f32.mrb[4].mxu0  ;;  %v5087_v55 = vadd.f32 %v3444_v43, %v5058_v19  ;;  %v2365_v23 = vpop.f32.mrb[5].mxu1 }
 0x1e2   : > { %v2310_v31 = vadd.f32 %v3428_v2, %v5058_v19  ;;  %v2301_v41 = vpop.f32.mrb[5].mxu0  ;;  %v5091_v48 = vadd.f32 %v5058_v19, %v2365_v23  ;;  %v3445_v17 = vpop.f32.mrb[6].mxu1 }
 0x1e3   : > { %v3225_v10 = vmul.f32 -1.442695, %v5087_v55  ;;  %v2302_v25 = vadd.f32 %v5058_v19, %v2301_v41  ;;  %v3429_v7 = vpop.f32.mrb[6].mxu0  ;;  %v2377_v18 = vadd.f32 %v3445_v17, %v5058_v19  ;;  %v2368_v6 = vpop.f32.mrb[7].mxu1 }
 0x1e4   : > { %v3209_v61 = vmul.f32 -1.442695, %v2310_v31  ;;  %v3223_v5 = vmul.f32 -1.442695, %v5091_v48  ;;  %v2313_v13 = vadd.f32 %v3429_v7, %v5058_v19  ;;  %v2304_v4 = vpop.f32.mrb[7].mxu0  ;;  %v2369_v37 = vadd.f32 %v5058_v19, %v2368_v6 }
 0x1e5   : > { %3674 = vpow2.f32 %v3225_v10  ;;  %v3207_v28 = vmul.f32 -1.442695, %v2302_v25  ;;  %v2305_v3 = vadd.f32 %v5058_v19, %v2304_v4  ;;  %v3226_v32 = vmul.f32 -1.442695, %v2377_v18 }
 0x1e6   : > { %3676 = vpow2.f32 %v3209_v61  ;;  %v3210_v29 = vmul.f32 -1.442695, %v2313_v13  ;;  %v3224_v47 = vmul.f32 -1.442695, %v2369_v37 }
 0x1e7   : > { %3678 = vpow2.f32 %v3207_v28  ;;  %v3208_v44 = vmul.f32 -1.442695, %v2305_v3 }
 0x1e8   : > { %3680 = vpow2.f32 %v3223_v5 }
 0x1e9   : > { %3682 = vpow2.f32 %v3210_v29 }
 0x1ea   : > { %3684 = vpow2.f32 %v3226_v32 }
 0x1eb   : > { %3686 = vpow2.f32 %v3208_v44 }
 0x1ec   : > { %3688 = vpow2.f32 %v3224_v47 }
 0x1ef   : > { %v3675_v0 = vpop.eup %3674 }
 0x1f0   : > { %v3677_v57 = vpop.eup %3676  ;;  %v2530_v33 = vadd.f32 1.0, %v3675_v0 }
 0x1f1   : > { %v3679_v60 = vpop.eup %3678  ;;  %v2514_v24 = vadd.f32 1.0, %v3677_v57 }
 0x1f2   : > { %v3681_v27 = vpop.eup %3680  ;;  %3690 = vrcp.f32 %v2530_v33  ;;  %v2512_v54 = vadd.f32 1.0, %v3679_v60 }
 0x1f3   : > { %v3683_v11 = vpop.eup %3682  ;;  %3692 = vrcp.f32 %v2514_v24  ;;  %v2528_v53 = vadd.f32 1.0, %v3681_v27 }
 0x1f4   : > { %v3685_v40 = vpop.eup %3684  ;;  %3694 = vrcp.f32 %v2512_v54  ;;  %v2515_v51 = vadd.f32 1.0, %v3683_v11 }
 0x1f5   : > { %v3687_v21 = vpop.eup %3686  ;;  %3696 = vrcp.f32 %v2528_v53  ;;  %v2531_v20 = vadd.f32 1.0, %v3685_v40 }
 0x1f6   : > { %v3689_v36 = vpop.eup %3688  ;;  %3698 = vrcp.f32 %v2515_v51  ;;  %v2513_v46 = vadd.f32 1.0, %v3687_v21 }
 0x1f7   : > { %3700 = vrcp.f32 %v2531_v20  ;;  %v2529_v52 = vadd.f32 1.0, %v3689_v36 }
 0x1f8   : > { %3702 = vrcp.f32 %v2513_v46 }
 0x1f9   : > { %3704 = vrcp.f32 %v2529_v52 }
 0x1fc   : > { %v3691_v15 = vpop.eup %3690 }
 0x1fd   : > { %v3693_v45 = vpop.eup %3692  ;;  %v2626_v59 = vmul.f32 %v3691_v15, %v5087_v55 }
 0x1fe   : > { %v3695_v26 = vpop.eup %3694  ;;  %v2610_v42 = vmul.f32 %v3693_v45, %v2310_v31 }
 0x1ff   : > { %v3697_v9 = vpop.eup %3696  ;;  %v2608_v22 = vmul.f32 %v3695_v26, %v2302_v25 }
 0x200   : > { %v3699_v39 = vpop.eup %3698  ;;  %v2624_v38 = vmul.f32 %v3697_v9, %v5091_v48 }
 0x201   : > { %v3701_v35 = vpop.eup %3700  ;;  %v2611_v50 = vmul.f32 %v3699_v39, %v2313_v13 }
 0x202   : > { %v3703_v12 = vpop.eup %3702  ;;  %v2627_v30 = vmul.f32 %v3701_v35, %v2377_v18 }
 0x203   : > { %v3705_v34 = vpop.eup %3704  ;;  %v3320_v56 = vpack.c.bf16 %v2611_v50, %v2610_v42  ;;  %v2609_v8 = vmul.f32 %v3703_v12, %v2305_v3 }
 0x204   : > { %v3360_v1 = vpack.c.bf16 %v2627_v30, %v2626_v59  ;;  %v2625_v62 = vmul.f32 %v3705_v34, %v2369_v37 }
 0x205   : > { %3384 = vst [vmem:[%s5079_s16 + $0x18] sm:$0xff] %v3320_v56   ;;  %v3315_v49 = vpack.c.bf16 %v2609_v8, %v2608_v22 }
 0x206   : > { %3392 = vst [vmem:[%s5079_s16 + $0x58] sm:$0xff] %v3360_v1   ;;  %v3355_v58 = vpack.c.bf16 %v2625_v62, %v2624_v38 }
 0x207   : > { %3383 = vst [vmem:[%s5079_s16 + $0x10] sm:$0xff] %v3315_v49  }
 0x208   : > { %3391 = vst [vmem:[%s5079_s16 + $0x50] sm:$0xff] %v3355_v58  }
 0x220   : > { %v3448_v63 = vpop.f32.mrb[8].mxu1 }
 0x221   : > { %v3432_v16 = vpop.f32.mrb[8].mxu0  ;;  %v5107_v14 = vadd.f32 %v3448_v63, %v5058_v19  ;;  %v2381_v43 = vpop.f32.mrb[9].mxu1 }
 0x222   : > { %v2326_v2 = vadd.f32 %v3432_v16, %v5058_v19  ;;  %v2317_v55 = vpop.f32.mrb[9].mxu0  ;;  %v5111_v23 = vadd.f32 %v5058_v19, %v2381_v43  ;;  %v3449_v31 = vpop.f32.mrb[10].mxu1 }
 0x223   : > { %v3229_v41 = vmul.f32 -1.442695, %v5107_v14  ;;  %v2318_v48 = vadd.f32 %v5058_v19, %v2317_v55  ;;  %v3433_v17 = vpop.f32.mrb[10].mxu0  ;;  %v2393_v10 = vadd.f32 %v3449_v31, %v5058_v19  ;;  %v2384_v25 = vpop.f32.mrb[11].mxu1 }
 0x224   : > { %v3213_v7 = vmul.f32 -1.442695, %v2326_v2  ;;  %v3227_v18 = vmul.f32 -1.442695, %v5111_v23  ;;  %v2329_v6 = vadd.f32 %v3433_v17, %v5058_v19  ;;  %v2320_v61 = vpop.f32.mrb[11].mxu0  ;;  %v2385_v5 = vadd.f32 %v5058_v19, %v2384_v25 }
 0x225   : > { %3706 = vpow2.f32 %v3229_v41  ;;  %v3211_v13 = vmul.f32 -1.442695, %v2318_v48  ;;  %v2321_v4 = vadd.f32 %v5058_v19, %v2320_v61  ;;  %v3230_v28 = vmul.f32 -1.442695, %v2393_v10 }
 0x226   : > { %3708 = vpow2.f32 %v3213_v7  ;;  %v3214_v37 = vmul.f32 -1.442695, %v2329_v6  ;;  %v3228_v29 = vmul.f32 -1.442695, %v2385_v5 }
 0x227   : > { %3710 = vpow2.f32 %v3211_v13  ;;  %v3212_v3 = vmul.f32 -1.442695, %v2321_v4 }
 0x228   : > { %3712 = vpow2.f32 %v3227_v18 }
 0x229   : > { %3714 = vpow2.f32 %v3214_v37 }
 0x22a   : > { %3716 = vpow2.f32 %v3230_v28 }
 0x22b   : > { %3718 = vpow2.f32 %v3212_v3 }
 0x22c   : > { %3720 = vpow2.f32 %v3228_v29 }
 0x22f   : > { %v3707_v32 = vpop.eup %3706 }
 0x230   : > { %v3709_v44 = vpop.eup %3708  ;;  %v2534_v47 = vadd.f32 1.0, %v3707_v32 }
 0x231   : > { %v3711_v0 = vpop.eup %3710  ;;  %v2518_v57 = vadd.f32 1.0, %v3709_v44 }
 0x232   : > { %v3713_v33 = vpop.eup %3712  ;;  %3722 = vrcp.f32 %v2534_v47  ;;  %v2516_v60 = vadd.f32 1.0, %v3711_v0 }
 0x233   : > { %v3715_v24 = vpop.eup %3714  ;;  %3724 = vrcp.f32 %v2518_v57  ;;  %v2532_v27 = vadd.f32 1.0, %v3713_v33 }
 0x234   : > { %v3717_v54 = vpop.eup %3716  ;;  %3726 = vrcp.f32 %v2516_v60  ;;  %v2519_v11 = vadd.f32 1.0, %v3715_v24 }
 0x235   : > { %v3719_v53 = vpop.eup %3718  ;;  %3728 = vrcp.f32 %v2532_v27  ;;  %v2535_v40 = vadd.f32 1.0, %v3717_v54 }
 0x236   : > { %v3721_v51 = vpop.eup %3720  ;;  %3730 = vrcp.f32 %v2519_v11  ;;  %v2517_v21 = vadd.f32 1.0, %v3719_v53 }
 0x237   : > { %3732 = vrcp.f32 %v2535_v40  ;;  %v2533_v20 = vadd.f32 1.0, %v3721_v51 }
 0x238   : > { %3734 = vrcp.f32 %v2517_v21 }
 0x239   : > { %3736 = vrcp.f32 %v2533_v20 }
 0x23c   : > { %v3723_v36 = vpop.eup %3722 }
 0x23d   : > { %v3725_v46 = vpop.eup %3724  ;;  %v2630_v42 = vmul.f32 %v3723_v36, %v5107_v14 }
 0x23e   : > { %v3727_v52 = vpop.eup %3726  ;;  %v2614_v9 = vmul.f32 %v3725_v46, %v2326_v2 }
 0x23f   : > { %v3729_v15 = vpop.eup %3728  ;;  %v2612_v59 = vmul.f32 %v3727_v52, %v2318_v48 }
 0x240   : > { %v3731_v45 = vpop.eup %3730  ;;  %v2628_v22 = vmul.f32 %v3729_v15, %v5111_v23 }
 0x241   : > { %v3733_v26 = vpop.eup %3732  ;;  %v2615_v39 = vmul.f32 %v3731_v45, %v2329_v6 }
 0x242   : > { %v3735_v35 = vpop.eup %3734  ;;  %v2631_v50 = vmul.f32 %v3733_v26, %v2393_v10 }
 0x243   : > { %v3737_v12 = vpop.eup %3736  ;;  %v3330_v30 = vpack.c.bf16 %v2615_v39, %v2614_v9  ;;  %v2613_v34 = vmul.f32 %v3735_v35, %v2321_v4 }
 0x244   : > { %v3370_v56 = vpack.c.bf16 %v2631_v50, %v2630_v42  ;;  %v2629_v8 = vmul.f32 %v3737_v12, %v2385_v5 }
 0x245   : > { %3386 = vst [vmem:[%s5079_s16 + $0x28] sm:$0xff] %v3330_v30   ;;  %v3325_v38 = vpack.c.bf16 %v2613_v34, %v2612_v59 }
 0x246   : > { %3394 = vst [vmem:[%s5079_s16 + $0x68] sm:$0xff] %v3370_v56   ;;  %v3365_v1 = vpack.c.bf16 %v2629_v8, %v2628_v22 }
 0x247   : > { %3385 = vst [vmem:[%s5079_s16 + $0x20] sm:$0xff] %v3325_v38  }
 0x248   : > { %3393 = vst [vmem:[%s5079_s16 + $0x60] sm:$0xff] %v3365_v1  }
 0x25c   : > { %v3452_v62 = vpop.f32.mrb[12].mxu1 }
 0x25d   : > { %v3436_v49 = vpop.f32.mrb[12].mxu0  ;;  %v5127_v58 = vadd.f32 %v3452_v62, %v5058_v19  ;;  %v2397_v63 = vpop.f32.mrb[13].mxu1 }
 0x25e   : > { %v2342_v16 = vadd.f32 %v3436_v49, %v5058_v19  ;;  %v2333_v14 = vpop.f32.mrb[13].mxu0  ;;  %v5131_v43 = vadd.f32 %v5058_v19, %v2397_v63  ;;  %v3453_v2 = vpop.f32.mrb[14].mxu1 }
 0x25f   : > { %v3233_v55 = vmul.f32 -1.442695, %v5127_v58  ;;  %v2334_v23 = vadd.f32 %v5058_v19, %v2333_v14  ;;  %v3437_v31 = vpop.f32.mrb[14].mxu0  ;;  %v2409_v41 = vadd.f32 %v3453_v2, %v5058_v19  ;;  %v2400_v48 = vpop.f32.mrb[15].mxu1 }
 0x260   : > { %v3217_v17 = vmul.f32 -1.442695, %v2342_v16  ;;  %v3231_v10 = vmul.f32 -1.442695, %v5131_v43  ;;  %v2345_v25 = vadd.f32 %v3437_v31, %v5058_v19  ;;  %v2336_v7 = vpop.f32.mrb[15].mxu0  ;;  %v2401_v18 = vadd.f32 %v5058_v19, %v2400_v48 }
 0x261   : > { %3738 = vpow2.f32 %v3233_v55  ;;  %v3215_v6 = vmul.f32 -1.442695, %v2334_v23  ;;  %v2337_v61 = vadd.f32 %v5058_v19, %v2336_v7  ;;  %v3234_v13 = vmul.f32 -1.442695, %v2409_v41 }
 0x262   : > { %3740 = vpow2.f32 %v3217_v17  ;;  %v3218_v5 = vmul.f32 -1.442695, %v2345_v25  ;;  %v3232_v37 = vmul.f32 -1.442695, %v2401_v18 }
 0x263   : > { %3742 = vpow2.f32 %v3215_v6  ;;  %v3216_v4 = vmul.f32 -1.442695, %v2337_v61 }
 0x264   : > { %3744 = vpow2.f32 %v3231_v10 }
 0x265   : > { %3746 = vpow2.f32 %v3218_v5 }
 0x266   : > { %3748 = vpow2.f32 %v3234_v13 }
 0x267   : > { %3750 = vpow2.f32 %v3216_v4 }
 0x268   : > { %3752 = vpow2.f32 %v3232_v37 }
 0x26b   : > { %v3739_v28 = vpop.eup %3738 }
 0x26c   : > { %v3741_v3 = vpop.eup %3740  ;;  %v2538_v29 = vadd.f32 1.0, %v3739_v28 }
 0x26d   : > { %v3743_v32 = vpop.eup %3742  ;;  %v2522_v44 = vadd.f32 1.0, %v3741_v3 }
 0x26e   : > { %v3745_v47 = vpop.eup %3744  ;;  %3754 = vrcp.f32 %v2538_v29  ;;  %v2520_v0 = vadd.f32 1.0, %v3743_v32 }
 0x26f   : > { %v3747_v19 = vpop.eup %3746  ;;  %3756 = vrcp.f32 %v2522_v44  ;;  %v2536_v57 = vadd.f32 1.0, %v3745_v47 }
 0x270   : > { %v3749_v33 = vpop.eup %3748  ;;  %3758 = vrcp.f32 %v2520_v0  ;;  %v2523_v60 = vadd.f32 1.0, %v3747_v19 }
 0x271   : > { %v3751_v24 = vpop.eup %3750  ;;  %3760 = vrcp.f32 %v2536_v57  ;;  %v2539_v27 = vadd.f32 1.0, %v3749_v33 }
 0x272   : > { %v3753_v54 = vpop.eup %3752  ;;  %3762 = vrcp.f32 %v2523_v60  ;;  %v2521_v11 = vadd.f32 1.0, %v3751_v24 }
 0x273   : > { %3764 = vrcp.f32 %v2539_v27  ;;  %v2537_v53 = vadd.f32 1.0, %v3753_v54 }
 0x274   : > { %3766 = vrcp.f32 %v2521_v11 }
 0x275   : > { %3768 = vrcp.f32 %v2537_v53 }
 0x278   : > { %v3755_v40 = vpop.eup %3754 }
 0x279   : > { %v3757_v51 = vpop.eup %3756  ;;  %v2634_v26 = vmul.f32 %v3755_v40, %v5127_v58 }
 0x27a   : > { %v3759_v21 = vpop.eup %3758  ;;  %v2618_v52 = vmul.f32 %v3757_v51, %v2342_v16 }
 0x27b   : > { %v3761_v20 = vpop.eup %3760  ;;  %v2616_v35 = vmul.f32 %v3759_v21, %v2334_v23 }
 0x27c   : > { %v3763_v36 = vpop.eup %3762  ;;  %v2632_v12 = vmul.f32 %v3761_v20, %v5131_v43 }
 0x27d   : > { %v3765_v46 = vpop.eup %3764  ;;  %v2619_v15 = vmul.f32 %v3763_v36, %v2345_v25 }
 0x27e   : > { %v3767_v45 = vpop.eup %3766  ;;  %v2635_v9 = vmul.f32 %v3765_v46, %v2409_v41 }
 0x27f   : > { %v3769_v39 = vpop.eup %3768  ;;  %v3340_v42 = vpack.c.bf16 %v2619_v15, %v2618_v52  ;;  %v2617_v50 = vmul.f32 %v3767_v45, %v2337_v61 }
 0x280   : > { %v3380_v59 = vpack.c.bf16 %v2635_v9, %v2634_v26  ;;  %v2633_v30 = vmul.f32 %v3769_v39, %v2401_v18 }
 0x281   : > { %3388 = vst [vmem:[%s5079_s16 + $0x38] sm:$0xff] %v3340_v42   ;;  %v3335_v34 = vpack.c.bf16 %v2617_v50, %v2616_v35 }
 0x282   : > { %3396 = vst [vmem:[%s5079_s16 + $0x78] sm:$0xff] %v3380_v59   ;;  %v3375_v22 = vpack.c.bf16 %v2633_v30, %v2632_v12 }
 0x283   : > { %3387 = vst [vmem:[%s5079_s16 + $0x30] sm:$0xff] %v3335_v34  }
 0x284   : > { %3395 = vst [vmem:[%s5079_s16 + $0x70] sm:$0xff] %v3375_v22  }
 0x285 PF: > { %s13_s14 = sadd.s32 1, %s3792_s14   ;;  %s5171_s12 = smov %s3788_s13 }
 0x286   : > { %p10_p5 = scmp.ge.s32.totalorder %s13_s14, 4   ;;  %s5172_s13 = smov %s5174_s15 }
 0x288   :  { %12 = sbr.rel (!%p10_p5) target bundleno = 2 (0x2), region = 70 }

</bundles_post_ra>
